<compile_context>
chip_gen: v5e
topology: v5e:2x2
jax: 0.10.0
libtpu: 0.0.40
codegen_flags: <defaults>
</compile_context>

<pallas_src>
import functools
import math

import jax
import jax.numpy as jnp
from jax import lax
from jax.experimental import pallas as pl
from jax.experimental.pallas import tpu as pltpu

_MASK_VALUE = -1e30  # large finite negative avoids exp(-inf - -inf) NaN corner cases
_NL = 128            # lane width used for the lane-dense m/l softmax scratch


def _lane_rep(x, n):
    """x: (rows, L) with identical values along lanes -> (rows, n)."""
    r = x.shape[-1]
    if n == r:
        return x
    if n < r:
        return x[..., :n]
    reps = -(-n // r)
    y = jnp.concatenate([x] * reps, axis=-1)
    return y if y.shape[-1] == n else y[..., :n]


# --------------------------------------------------------------------------- #
# Kernel 1: fused QKV projection, outputs written in (B, H, T, head_dim) layout
# --------------------------------------------------------------------------- #
def _qkv_proj_kernel(x_ref, w_ref, q_ref, k_ref, v_ref, *, mxu_dtype):
    num_heads, head_dim = q_ref.shape[1], q_ref.shape[3]
    d_out = num_heads * head_dim

    x = x_ref[0].astype(mxu_dtype)                       # (tp, d_in)
    # One MXU RHS push: (tp, d_in) @ (d_in, 3*d_out), f32 accumulation.
    qkv = jnp.dot(x, w_ref[...], preferred_element_type=jnp.float32)

    # Head split happens here (static lane slices, in-VMEM) -> no HBM transpose pass.
    for h in range(num_heads):
        lo = h * head_dim
        q_ref[0, h] = qkv[:, lo:lo + head_dim].astype(q_ref.dtype)
        k_ref[0, h] = qkv[:, d_out + lo:d_out + lo + head_dim].astype(k_ref.dtype)
        v_ref[0, h] = qkv[:, 2 * d_out + lo:2 * d_out + lo + head_dim].astype(v_ref.dtype)


# --------------------------------------------------------------------------- #
# Kernel 2: flash-style causal attention (grid = (B, H, q_tiles, kv_tiles))
# --------------------------------------------------------------------------- #
def _flash_attn_kernel(q_ref, k_ref, v_ref, o_ref, m_ref, l_ref, acc_ref):
    qi = pl.program_id(2)
    ki = pl.program_id(3)
    q_tile = q_ref.shape[2]
    kv_tile = k_ref.shape[2]
    head_dim = q_ref.shape[3]

    @pl.when(ki == 0)
    def _():
        m_ref[...] = jnp.full(m_ref.shape, _MASK_VALUE, jnp.float32)
        l_ref[...] = jnp.zeros(l_ref.shape, jnp.float32)
        acc_ref[...] = jnp.zeros(acc_ref.shape, jnp.float32)

    # Causal block skipping (compute). The K/V BlockSpec index_maps clamp the kv
    # block index for these iterations, so their DMAs are skipped as well.
    @pl.when(ki * kv_tile < (qi + 1) * q_tile)
    def _():
        q = q_ref[0, 0]                                   # (tq, hd); 1/sqrt(hd) pre-folded
        k = k_ref[0, 0]                                   # (tkv, hd)
        v = v_ref[0, 0]                                   # (tkv, hd)

        # q @ k^T without materializing a transpose: contract head_dim of both.
        s = lax.dot_general(q, k, (((1,), (1,)), ((), ())),
                            preferred_element_type=jnp.float32)     # (tq, tkv)

        row = qi * q_tile + lax.broadcasted_iota(jnp.int32, s.shape, 0)
        col = ki * kv_tile + lax.broadcasted_iota(jnp.int32, s.shape, 1)
        s = jnp.where(col <= row, s, _MASK_VALUE)

        m_prev = m_ref[...]                               # (tq, 128), lane-broadcast
        l_prev = l_ref[...]
        m_next = jnp.maximum(m_prev, s.max(axis=-1, keepdims=True))
        alpha = jnp.exp(m_prev - m_next)                  # (tq, 128)
        p = jnp.exp(s - _lane_rep(m_next, kv_tile))       # (tq, tkv)
        l_ref[...] = alpha * l_prev + p.sum(axis=-1, keepdims=True)
        acc_ref[...] = (_lane_rep(alpha, head_dim) * acc_ref[...] +
                        jnp.dot(p.astype(v.dtype), v,
                                preferred_element_type=jnp.float32))
        m_ref[...] = m_next

    @pl.when(ki == pl.num_programs(3) - 1)
    def _():
        inv = pl.reciprocal(l_ref[...], approx=True)      # EUP slot, ~free
        o_ref[0, 0] = (acc_ref[...] * _lane_rep(inv, head_dim)).astype(o_ref.dtype)


# --------------------------------------------------------------------------- #
# Kernel 3: output projection (in-kernel head merge + single full-depth matmul)
# --------------------------------------------------------------------------- #
def _out_proj_kernel(ctx_ref, wo_ref, bo_ref, o_ref):
    num_heads = ctx_ref.shape[1]
    # Merge heads along lanes in VMEM (no HBM transpose pass), then one
    # (tp, d_out) @ (d_out, d_out) MXU matmul with full-d_out contraction depth.
    ctx = jnp.concatenate([ctx_ref[0, h] for h in range(num_heads)], axis=-1)
    out = jnp.dot(ctx, wo_ref[...], preferred_element_type=jnp.float32)
    o_ref[0] = (out + bo_ref[...].astype(jnp.float32)).astype(o_ref.dtype)


# --------------------------------------------------------------------------- #
# Wrapper
# --------------------------------------------------------------------------- #
def multi_head_attention(x, wq, wk, wv, wo, bo, *, num_heads,
                         q_tile=256, kv_tile=512, proj_tile=256,
                         mxu_dtype=jnp.bfloat16,
                         vmem_limit_bytes=64 * 1024 * 1024):
    """x: (B,T,d_in); wq/wk/wv: (d_in,d_out); wo: (d_out,d_out); bo: (d_out,)."""
    B, T, d_in = x.shape
    d_out = wq.shape[1]
    assert d_out % num_heads == 0
    head_dim = d_out // num_heads

    q_tile = min(q_tile, T)
    kv_tile = min(kv_tile, T)
    proj_tile = min(proj_tile, T)
    assert T % q_tile == 0 and T % kv_tile == 0 and T % proj_tile == 0
    assert q_tile % 8 == 0 and kv_tile % 8 == 0 and proj_tile % 8 == 0

    # Host-side weight prep (tiny one-off ops, amortized across all calls by jit):
    #  - fold 1/sqrt(head_dim) into W_query (removes the in-kernel scale multiply),
    #  - fuse W_q/W_k/W_v into one (d_in, 3*d_out) weight (one MXU RHS per x tile),
    #  - cast weights to the MXU dtype so their DMAs move half the bytes for bf16.
    scale = 1.0 / math.sqrt(head_dim)
    w_qkv = jnp.concatenate([wq * scale, wk, wv], axis=1).astype(mxu_dtype)
    wo_c = wo.astype(mxu_dtype)
    bo2 = bo.reshape(1, d_out).astype(jnp.float32)

    def cparams(sem):
        return pltpu.CompilerParams(dimension_semantics=sem,
                                    vmem_limit_bytes=vmem_limit_bytes)

    # ---- 1) fused QKV projection, written directly as (B, H, T, head_dim) ----
    # TODO(synk): for large d_out on v7x (64 MiB VMEM), single-buffer the fused
    # weight (pipeline_mode=pl.Buffered(1)) or add an N-tiling grid axis over
    # 3*d_out to halve the resident weight footprint.
    qkv_out = jax.ShapeDtypeStruct((B, num_heads, T, head_dim), mxu_dtype)
    q, k, v = pl.pallas_call(
        functools.partial(_qkv_proj_kernel, mxu_dtype=mxu_dtype),
        out_shape=(qkv_out, qkv_out, qkv_out),
        grid_spec=pltpu.PrefetchScalarGridSpec(
            num_scalar_prefetch=0,
            grid=(B, T // proj_tile),
            in_specs=[
                pl.BlockSpec((1, proj_tile, d_in), lambda b, t: (b, t, 0)),
                pl.BlockSpec((d_in, 3 * d_out), lambda b, t: (0, 0)),
            ],
            out_specs=[
                pl.BlockSpec((1, num_heads, proj_tile, head_dim),
                             lambda b, t: (b, 0, t, 0)),
                pl.BlockSpec((1, num_heads, proj_tile, head_dim),
                             lambda b, t: (b, 0, t, 0)),
                pl.BlockSpec((1, num_heads, proj_tile, head_dim),
                             lambda b, t: (b, 0, t, 0)),
            ],
        ),
        compiler_params=cparams(("parallel", "parallel")),
    )(x, w_qkv)

    # ---- 2) flash attention with causal block skipping (compute AND DMA) -----
    def last_kv(qi):
        # Last kv block index that is (at least partially) visible for q block qi.
        return ((qi + 1) * q_tile - 1) // kv_tile

    ctx = pl.pallas_call(
        _flash_attn_kernel,
        out_shape=jax.ShapeDtypeStruct((B, num_heads, T, head_dim), mxu_dtype),
        grid_spec=pltpu.PrefetchScalarGridSpec(
            num_scalar_prefetch=0,
            grid=(B, num_heads, T // q_tile, T // kv_tile),
            in_specs=[
                pl.BlockSpec((1, 1, q_tile, head_dim),
                             lambda b, h, qi, ki: (b, h, qi, 0)),
                # Clamp the kv block index so fully-masked tiles are never DMA'd
                # (pl.when alone only skips the compute, not the copy).
                pl.BlockSpec((1, 1, kv_tile, head_dim),
                             lambda b, h, qi, ki: (b, h, jnp.minimum(ki, last_kv(qi)), 0)),
                pl.BlockSpec((1, 1, kv_tile, head_dim),
                             lambda b, h, qi, ki: (b, h, jnp.minimum(ki, last_kv(qi)), 0)),
            ],
            out_specs=pl.BlockSpec((1, 1, q_tile, head_dim),
                                   lambda b, h, qi, ki: (b, h, qi, 0)),
            scratch_shapes=[
                pltpu.VMEM((q_tile, _NL), jnp.float32),        # running max m (lane-dense)
                pltpu.VMEM((q_tile, _NL), jnp.float32),        # running sum l (lane-dense)
                pltpu.VMEM((q_tile, head_dim), jnp.float32),   # output accumulator
            ],
        ),
        compiler_params=cparams(("parallel", "parallel", "parallel", "arbitrary")),
    )(q, k, v)

    # ---- 3) output projection: merge heads in-kernel + one full matmul -------
    out = pl.pallas_call(
        _out_proj_kernel,
        out_shape=jax.ShapeDtypeStruct((B, T, d_out), x.dtype),
        grid_spec=pltpu.PrefetchScalarGridSpec(
            num_scalar_prefetch=0,
            grid=(B, T // proj_tile),
            in_specs=[
                pl.BlockSpec((1, num_heads, proj_tile, head_dim),
                             lambda b, t: (b, 0, t, 0)),
                pl.BlockSpec((d_out, d_out), lambda b, t: (0, 0)),
                pl.BlockSpec((1, d_out), lambda b, t: (0, 0)),
            ],
            out_specs=pl.BlockSpec((1, proj_tile, d_out), lambda b, t: (b, t, 0)),
        ),
        compiler_params=cparams(("parallel", "parallel")),
    )(ctx, wo_c, bo2)

    return out


# --------------------------------------------------------------------------- #
# Pure-JAX reference (replica of the PyTorch forward in eval mode)
# --------------------------------------------------------------------------- #
def _reference(x, wq, wk, wv, wo, bo, *, num_heads):
    B, T, d_in = x.shape
    d_out = wq.shape[1]
    hd = d_out // num_heads
    q = (x @ wq).reshape(B, T, num_heads, hd).transpose(0, 2, 1, 3)
    k = (x @ wk).reshape(B, T, num_heads, hd).transpose(0, 2, 1, 3)
    v = (x @ wv).reshape(B, T, num_heads, hd).transpose(0, 2, 1, 3)
    scores = jnp.einsum("bhqd,bhkd->bhqk", q, k)
    mask = jnp.triu(jnp.ones((T, T), dtype=bool), k=1)
    scores = jnp.where(mask[None, None], -jnp.inf, scores)
    w = jax.nn.softmax(scores / math.sqrt(hd), axis=-1)
    ctx = jnp.einsum("bhqk,bhkd->bhqd", w, v).transpose(0, 2, 1, 3).reshape(B, T, d_out)
    return ctx @ wo + bo


if __name__ == "__main__":
    # Small shapes consistent with the module (GPT-like head_dim=64).
    B, T, d_in, d_out, num_heads = 2, 256, 128, 128, 2
    key = jax.random.PRNGKey(0)
    kx, k1, k2, k3, k4, k5 = jax.random.split(key, 6)

    x = jax.random.normal(kx, (B, T, d_in), dtype=jnp.float32)
    # Deterministic synthetic parameters (qkv_bias=False; out_proj has bias).
    wq = jax.random.normal(k1, (d_in, d_out), dtype=jnp.float32) * 0.1
    wk = jax.random.normal(k2, (d_in, d_out), dtype=jnp.float32) * 0.1
    wv = jax.random.normal(k3, (d_in, d_out), dtype=jnp.float32) * 0.1
    wo = jax.random.normal(k4, (d_out, d_out), dtype=jnp.float32) * 0.1
    bo = jax.random.normal(k5, (d_out,), dtype=jnp.float32) * 0.1

    ref = _reference(x, wq, wk, wv, wo, bo, num_heads=num_heads)

    # 1) f32 MXU-operand run with small tiles: exercises multi-tile online softmax,
    #    causal block skipping and the clamped K/V index_maps; tight tolerance.
    out = multi_head_attention(x, wq, wk, wv, wo, bo, num_heads=num_heads,
                               q_tile=128, kv_tile=128, proj_tile=128,
                               mxu_dtype=jnp.float32)
    out = jax.block_until_ready(out)
    assert out.shape == (B, T, d_out)
    max_err = float(jnp.max(jnp.abs(out - ref)))
    # Tolerance relaxed slightly for pl.reciprocal(approx=True) in the finalize.
    assert jnp.allclose(out, ref, atol=2e-2, rtol=2e-2), \
        f"f32 path mismatch vs reference (max abs err {max_err})"

    # 2) bf16 MXU-operand run with the default (larger) tiles: the fast path
    #    recommended for v5e/v6e/v7x; checked at a bf16-appropriate tolerance.
    out_bf = multi_head_attention(x, wq, wk, wv, wo, bo, num_heads=num_heads,
                                  mxu_dtype=jnp.bfloat16)
    out_bf = jax.block_until_ready(out_bf)
    max_err_bf = float(jnp.max(jnp.abs(out_bf - ref)))
    assert jnp.allclose(out_bf, ref, atol=1e-1, rtol=1e-1), \
        f"bf16 path mismatch vs reference (max abs err {max_err_bf})"

    print("KERNEL_OK")
</pallas_src>

<mosaic_0001>
module attributes {stable_mosaic.version = 11 : i64} {
  func.func @_qkv_proj_kernel(%arg0: i32, %arg1: i32, %arg2: memref<1x128x128xf32, #tpu.memory_space<vmem>>, %arg3: memref<128x384xf32, #tpu.memory_space<vmem>>, %arg4: memref<1x2x128x64xf32, #tpu.memory_space<vmem>>, %arg5: memref<1x2x128x64xf32, #tpu.memory_space<vmem>>, %arg6: memref<1x2x128x64xf32, #tpu.memory_space<vmem>>) attributes {dimension_semantics = [#tpu.dimension_semantics<parallel>, #tpu.dimension_semantics<parallel>], iteration_bounds = array<i64: 2, 2>, scalar_prefetch = 0 : i64, scratch_operands = 0 : i64, tpu.core_type = #tpu.core_type<tc>, window_params = [{transform_indices = @transform_0, window_bounds = array<i64: 1, 128, 128>}, {pipeline_mode = #tpu.pipeline_mode<synchronous>, transform_indices = @transform_1, window_bounds = array<i64: 128, 384>}, {transform_indices = @transform_2, window_bounds = array<i64: 1, 2, 128, 64>}, {transform_indices = @transform_3, window_bounds = array<i64: 1, 2, 128, 64>}, {transform_indices = @transform_4, window_bounds = array<i64: 1, 2, 128, 64>}]} {
    %c0 = arith.constant 0 : index
    %c0_0 = arith.constant 0 : index
    %c0_1 = arith.constant 0 : index
    %0 = vector.load %arg2[%c0, %c0_0, %c0_1] : memref<1x128x128xf32, #tpu.memory_space<vmem>>, vector<1x128x128xf32>
    %1 = vector.shape_cast %0 : vector<1x128x128xf32> to vector<128x128xf32>
    %c0_2 = arith.constant 0 : index
    %c0_3 = arith.constant 0 : index
    %2 = vector.load %arg3[%c0_2, %c0_3] : memref<128x384xf32, #tpu.memory_space<vmem>>, vector<128x384xf32>
    %cst = arith.constant dense<0.000000e+00> : vector<128x384xf32>
    %3 = tpu.matmul %1, %2, %cst {dimension_numbers = #tpu.dot_dimension_numbers<[1], [0], [0], [1], [0, 0, 1, 1], [], []>} : vector<128x128xf32>, vector<128x384xf32>, vector<128x384xf32> -> vector<128x384xf32>
    %4 = vector.extract_strided_slice %3 {offsets = [0, 0], sizes = [128, 64], strides = [1, 1]} : vector<128x384xf32> to vector<128x64xf32>
    %c0_4 = arith.constant 0 : index
    %c0_5 = arith.constant 0 : index
    %c0_6 = arith.constant 0 : index
    %c0_7 = arith.constant 0 : index
    %5 = vector.load %arg4[%c0_4, %c0_5, %c0_6, %c0_7] : memref<1x2x128x64xf32, #tpu.memory_space<vmem>>, vector<1x1x128x64xf32>
    %6 = vector.shape_cast %5 : vector<1x1x128x64xf32> to vector<128x64xf32>
    %7 = vector.shape_cast %4 : vector<128x64xf32> to vector<1x1x128x64xf32>
    tpu.vector_store %arg4[%c0_4, %c0_5, %c0_6, %c0_7], %7 {strides = array<i32>} : memref<1x2x128x64xf32, #tpu.memory_space<vmem>>, vector<1x1x128x64xf32>,
    %8 = vector.extract_strided_slice %3 {offsets = [0, 128], sizes = [128, 64], strides = [1, 1]} : vector<128x384xf32> to vector<128x64xf32>
    %c0_8 = arith.constant 0 : index
    %c0_9 = arith.constant 0 : index
    %c0_10 = arith.constant 0 : index
    %c0_11 = arith.constant 0 : index
    %9 = vector.load %arg5[%c0_8, %c0_9, %c0_10, %c0_11] : memref<1x2x128x64xf32, #tpu.memory_space<vmem>>, vector<1x1x128x64xf32>
    %10 = vector.shape_cast %9 : vector<1x1x128x64xf32> to vector<128x64xf32>
    %11 = vector.shape_cast %8 : vector<128x64xf32> to vector<1x1x128x64xf32>
    tpu.vector_store %arg5[%c0_8, %c0_9, %c0_10, %c0_11], %11 {strides = array<i32>} : memref<1x2x128x64xf32, #tpu.memory_space<vmem>>, vector<1x1x128x64xf32>,
    %12 = vector.extract_strided_slice %3 {offsets = [0, 256], sizes = [128, 64], strides = [1, 1]} : vector<128x384xf32> to vector<128x64xf32>
    %c0_12 = arith.constant 0 : index
    %c0_13 = arith.constant 0 : index
    %c0_14 = arith.constant 0 : index
    %c0_15 = arith.constant 0 : index
    %13 = vector.load %arg6[%c0_12, %c0_13, %c0_14, %c0_15] : memref<1x2x128x64xf32, #tpu.memory_space<vmem>>, vector<1x1x128x64xf32>
    %14 = vector.shape_cast %13 : vector<1x1x128x64xf32> to vector<128x64xf32>
    %15 = vector.shape_cast %12 : vector<128x64xf32> to vector<1x1x128x64xf32>
    tpu.vector_store %arg6[%c0_12, %c0_13, %c0_14, %c0_15], %15 {strides = array<i32>} : memref<1x2x128x64xf32, #tpu.memory_space<vmem>>, vector<1x1x128x64xf32>,
    %16 = vector.extract_strided_slice %3 {offsets = [0, 64], sizes = [128, 64], strides = [1, 1]} : vector<128x384xf32> to vector<128x64xf32>
    %c0_16 = arith.constant 0 : index
    %c1 = arith.constant 1 : index
    %c0_17 = arith.constant 0 : index
    %c0_18 = arith.constant 0 : index
    %17 = vector.load %arg4[%c0_16, %c1, %c0_17, %c0_18] : memref<1x2x128x64xf32, #tpu.memory_space<vmem>>, vector<1x1x128x64xf32>
    %18 = vector.shape_cast %17 : vector<1x1x128x64xf32> to vector<128x64xf32>
    %19 = vector.shape_cast %16 : vector<128x64xf32> to vector<1x1x128x64xf32>
    tpu.vector_store %arg4[%c0_16, %c1, %c0_17, %c0_18], %19 {strides = array<i32>} : memref<1x2x128x64xf32, #tpu.memory_space<vmem>>, vector<1x1x128x64xf32>,
    %20 = vector.extract_strided_slice %3 {offsets = [0, 192], sizes = [128, 64], strides = [1, 1]} : vector<128x384xf32> to vector<128x64xf32>
    %c0_19 = arith.constant 0 : index
    %c1_20 = arith.constant 1 : index
    %c0_21 = arith.constant 0 : index
    %c0_22 = arith.constant 0 : index
    %21 = vector.load %arg5[%c0_19, %c1_20, %c0_21, %c0_22] : memref<1x2x128x64xf32, #tpu.memory_space<vmem>>, vector<1x1x128x64xf32>
    %22 = vector.shape_cast %21 : vector<1x1x128x64xf32> to vector<128x64xf32>
    %23 = vector.shape_cast %20 : vector<128x64xf32> to vector<1x1x128x64xf32>
    tpu.vector_store %arg5[%c0_19, %c1_20, %c0_21, %c0_22], %23 {strides = array<i32>} : memref<1x2x128x64xf32, #tpu.memory_space<vmem>>, vector<1x1x128x64xf32>,
    %24 = vector.extract_strided_slice %3 {offsets = [0, 320], sizes = [128, 64], strides = [1, 1]} : vector<128x384xf32> to vector<128x64xf32>
    %c0_23 = arith.constant 0 : index
    %c1_24 = arith.constant 1 : index
    %c0_25 = arith.constant 0 : index
    %c0_26 = arith.constant 0 : index
    %25 = vector.load %arg6[%c0_23, %c1_24, %c0_25, %c0_26] : memref<1x2x128x64xf32, #tpu.memory_space<vmem>>, vector<1x1x128x64xf32>
    %26 = vector.shape_cast %25 : vector<1x1x128x64xf32> to vector<128x64xf32>
    %27 = vector.shape_cast %24 : vector<128x64xf32> to vector<1x1x128x64xf32>
    tpu.vector_store %arg6[%c0_23, %c1_24, %c0_25, %c0_26], %27 {strides = array<i32>} : memref<1x2x128x64xf32, #tpu.memory_space<vmem>>, vector<1x1x128x64xf32>,
    return
  }
  func.func @transform_0(%arg0: i32, %arg1: i32) -> (i32, i32, i32) {
    %c0_i32 = arith.constant 0 : i32
    %c0_i32_0 = arith.constant 0 : i32
    return %arg0, %arg1, %c0_i32 : i32, i32, i32
  }
  func.func @transform_1(%arg0: i32, %arg1: i32) -> (i32, i32) {
    %c0_i32 = arith.constant 0 : i32
    %c0_i32_0 = arith.constant 0 : i32
    %c0_i32_1 = arith.constant 0 : i32
    return %c0_i32, %c0_i32_0 : i32, i32
  }
  func.func @transform_2(%arg0: i32, %arg1: i32) -> (i32, i32, i32, i32) {
    %c0_i32 = arith.constant 0 : i32
    %c0_i32_0 = arith.constant 0 : i32
    %c0_i32_1 = arith.constant 0 : i32
    return %arg0, %c0_i32, %arg1, %c0_i32_0 : i32, i32, i32, i32
  }
  func.func @transform_3(%arg0: i32, %arg1: i32) -> (i32, i32, i32, i32) {
    %c0_i32 = arith.constant 0 : i32
    %c0_i32_0 = arith.constant 0 : i32
    %c0_i32_1 = arith.constant 0 : i32
    return %arg0, %c0_i32, %arg1, %c0_i32_0 : i32, i32, i32, i32
  }
  func.func @transform_4(%arg0: i32, %arg1: i32) -> (i32, i32, i32, i32) {
    %c0_i32 = arith.constant 0 : i32
    %c0_i32_0 = arith.constant 0 : i32
    %c0_i32_1 = arith.constant 0 : i32
    return %arg0, %c0_i32, %arg1, %c0_i32_0 : i32, i32, i32, i32
  }
}

</mosaic_0001>

<bundles_post_ra>
// kernel: tpu_custom_call.1
= control target key start
LH: loop header
LB: loop body
LE: loop exit
PB: predicated region body
PF: predicated region fallthrough
CT: control target
= control target key end

     0   :  { %s2611_s0 = inlined_call_operand.hbm [shape: f32[2,256,128], index: 0, kind: input, shape index: {}]   ;;  %s2612_s1 = inlined_call_operand.hbm [shape: f32[128,384], index: 1, kind: input, shape index: {}]   ;;  %s2613_s2 = inlined_call_operand.vmem [shape: f32[2,2,256,64], index: 2, kind: output, shape index: {0}]   ;;  %s2614_s3 = inlined_call_operand.vmem [shape: f32[2,2,256,64], index: 3, kind: output, shape index: {1}]   ;;  %s2615_s4 = inlined_call_operand.vmem [shape: f32[2,2,256,64], index: 4, kind: output, shape index: {2}]  }
   0x1   :  { %2617 = sst [smem:[#allocation12_spill]] %s2612_s1 }
   0x2   :  { %2618 = sst [smem:[#allocation13_spill]] %s2613_s2 }
   0x3   :  { %2619 = sst [smem:[#allocation14_spill]] %s2614_s3 }
   0x4   :  { %2620 = sst [smem:[#allocation15_spill]] %s2615_s4 }
   0x5   :  { %10 = vsyncpa [#allocation3], 0 }
   0x6   :  { %12 = vsyncpa [#allocation3 + $0x1], 0 }
   0x7   :  { %13 = vsyncpa [#allocation5], 0  ;;  %s1854_s15 = smov 0   ;;  %s1856_s16 = smov 0  }
   0x8   :  { %s1858_s17 = smov 0   ;;  %s1860_s18 = smov 0  }
   0x9   :  { %s1862_s19 = smov 0   ;;  %s1864_s20 = smov 0  }
   0xa   :  { %s1866_s21 = smov 0   ;;  %s1868_s22 = smov 0  }
   0xb LB: > { %s1479_s23 = sadd.s32 4294967295, %s1821_s22   ;;  %p53_p0 = scmp.ne.s32.totalorder %s1797_s16, %s1793_s15  ;;  %s1821_s22 = sphi %s1868_s22, %s19_s22   ;;  %s1817_s21 = sphi %s1866_s21, %s2639_s21   ;;  %s1813_s20 = sphi %s1864_s20, %s2638_s20   ;;  %s1809_s19 = sphi %s1862_s19, %s2637_s19   ;;  %s1805_s18 = sphi %s1860_s18, %s2636_s18   ;;  %s1801_s17 = sphi %s1858_s17, %s2635_s17   ;;  %s1797_s16 = sphi %s1856_s16, %s2634_s16   ;;  %s1793_s15 = sphi %s1854_s15, %s2633_s15  }
   0xc   : > { %p1894_p1 = scmp.eq.s32.totalorder %s1479_s23, 0  ;;  %p1898_p2 = scmp.eq.s32.totalorder %s1479_s23, 3 }
   0xd   : > { %p1481_p3 = scmp.ge.s32.totalorder %s1821_s22, 1  ;;  %p169_p4 = scmp.lt.s32.totalorder %s1821_s22, 5 }
   0xe   : > { %p1906_p5 = por %p1894_p1, %p53_p0  ;;  %s2625_s1 = sld [smem:[#allocation12_spill]] }
   0xf   : > { %p1910_p6 = pnand %p1481_p3, %p169_p4  ;;  %s1823_s5 = smov [#allocation4]  }
  0x10   : > { %s182_s6 = sshll.u32 %s1823_s5, 4  ;;  %s1824_s7 = smov 384   ;;  %s183_s6 = int_to_ptr.vmem [resolvable:$true] %s182_s6 }
  0x11   : > { %p1610_p7 = pneg %p1910_p6  ;;  %s1825_s8 = smov 24  }
  0x12   : > { %s28_s9 = sadd.s32 1, %s1813_s20  ;;  %s31_s10 = sadd.s32 1, %s1817_s21 }
  0x13   : > { %p1611_p8 = pnand %p1610_p7, %p1894_p1  ;;  %p29_p9 = scmp.ge.s32.totalorder %s28_s9, 2 }
  0x14   : > { %s180_s30 = sshll.u32 %s2625_s1, 4  ;;  %s40_s11 = sadd.s32 1, %s1801_s17  ;;  %s181_s30 = int_to_ptr.hbm [resolvable:$true] %s180_s30 }
  0x15   : > { %1613 = dma.hbm_to_vmem [thread:$0]  (!%p1611_p8), %s181_s30, 6144, %s183_s6, [#allocation5], %s1824_s7, %s1824_s7, %s1825_s8  }
  0x16   : > { %p47_p10 = scmp.ne.s32.totalorder %s1801_s17, %s1797_s16  ;;  %p48_p11 = scmp.eq.s32.totalorder %s1821_s22, 0 }
  0x17   : > { %s2641_s9 = smov (%p29_p9, %s28_s9), 0  ;;  %s2643_s10 = smov (!%p29_p9, %s31_s10), %s1817_s21 }
  0x18   : > { %2626 = sst [smem:[#allocation11_spill]] %s2641_s9  ;;  %s36_s12 = ssub.s32 %s1813_s20, %s2641_s9 }
  0x19   : > { %p1932_p12 = por %p48_p11, %p47_p10  ;;  %p33_p13 = scmp.ge.s32.totalorder %s2643_s10, 2 }
  0x1a   : > { %p1938_p0 = por %p1898_p2, %p47_p10  ;;  %p1619_p3 = scmp.lt.s32.totalorder %s1821_s22, 4 }
  0x1b   : > { %s196_s15 = sand.u32 1, %s1801_s17   ;;  %s2645_s10 = smov (%p33_p13, %s2643_s10), 0 }
  0x1c   : > { %s1484_s23 = sshll.u32 %s196_s15, 7  ;;  %s35_s28 = ssub.s32 %s1817_s21, %s2645_s10 }
  0x1d   : > { %s37_s29 = sor.u32 %s36_s12, %s35_s28  ;;  %s1485_s30 = sshll.u32 %s1813_s20, 4 }
  0x1e   : > { %p38_p4 = scmp.eq.s32.totalorder %s37_s29, 0  ;;  %s1486_s5 = sshll.u32 %s1817_s21, 5 }
  0x1f   : > { %s205_s6 = sadd.s32 %s1486_s5, %s1485_s30  ;;  %s200_s7 = scalar_lea.vmem [#allocation2], %s1484_s23 }
  0x20   : > { %s210_s25 = sshll.u32 %s200_s7, 4  ;;  %s1487_s1 = sshll.u32 %s205_s6, 3  ;;  %s211_s25 = int_to_ptr.vmem [resolvable:$true] %s210_s25 }
  0x21   : > { %s1951_s8 = scalar_select %p38_p4, %s1801_s17, %s40_s11  }
  0x22   : > { %s207_s3 = scalar_lea.hbm %s2611_s0, %s1487_s1  ;;  %p1615_p2 = pnand %p1619_p3, %p1932_p12 }
  0x23   : > { %s208_s2 = sshll.u32 %s207_s3, 4  ;;  %s197_s12 = scalar_lea.sflag [#allocation3], %s196_s15  ;;  %s209_s2 = int_to_ptr.hbm [resolvable:$true] %s208_s2 }
  0x24   : > { %s1826_s28 = smov 128   ;;  %s1827_s29 = smov 8  }
  0x25   : > { %1617 = dma.hbm_to_vmem [thread:$0]  (!%p1615_p2), %s209_s2, 2048, %s211_s25, %s197_s12, %s1826_s28, %s1826_s28, %s1827_s29  }
  0x26   : > { %222 = sbr.rel (%p1910_p6) target bundleno = 527 (0x20f), region = 28  ;;  %s1963_s11 = sand.u32 (!%p1910_p6), 1, %s1797_s16  }
  0x27   : > { %s1489_s4 = sshll.u32 (!%p1910_p6), %s1963_s11, 7  ;;  %s225_s1 = scalar_lea.sflag (!%p1910_p6), [#allocation3], %s1963_s11 }
  0x28   : > { %s1967_s9 = scalar_lea.vmem (!%p1910_p6), [#allocation2], %s1489_s4 }
  0x2b   : > { %1784 = dma.done.wait (%p1906_p5), %s225_s1, 2048  }
  0x2c   : > { %1786 = vsyncadd (%p1906_p5), %s225_s1, 4294965248 }
  0x2d   : > { %1788 = dma.done.wait (%p1894_p1), [#allocation5], 6144  }
  0x2e   : > { %1790 = vsyncadd (%p1894_p1), [#allocation5], 4294961152  ;;  %v331_v0 = vld [vmem:[#allocation4 + $0x168] sm:$0xff]  ;;  %v1977_v1 = vld [vmem:[#allocation4 + $0x178] sm:$0xff]  ;;  %s1491_s2 = sshll.u32 %s1963_s11, 8  ;;  %vm529_vm0 = vcmask 523264  }
  0x2f   : > { %v328_v2 = vld [vmem:[#allocation4 + $0x150] sm:$0xff]  ;;  %334 = vmatpush.msra.mxu0 %v331_v0  ;;  %1556 = vmatpush.msra.mxu3 %v331_v0  ;;  %v1979_v3 = vld [vmem:[#allocation4 + $0x160] sm:$0xff]  ;;  %v325_v4 = vld [vmem:[#allocation4 + $0x138] sm:$0xff]  ;;  %s2122_s3 = scalar_lea.vmem [#allocation6], %s1491_s2  ;;  %s1828_s24 = smov 64  }
  0x30   : > { %464 = vmatpush.msra.mxu2 %v1977_v1  ;;  %v1982_v5 = vld [vmem:[#allocation4 + $0x170] sm:$0xff]  ;;  %v1984_v6 = vld [vmem:[#allocation4 + $0x148] sm:$0xff]  ;;  %v1986_v7 = vld [vmem:[#allocation4 + $0x158] sm:$0xff]  ;;  %s2127_s26 = scalar_lea.vmem [#allocation7], %s1491_s2  ;;  %s2135_s27 = scalar_lea.vmem [#allocation8], %s1491_s2 }
  0x31   : > { %335 = vmatpush.msra.mxu0 %v328_v2  ;;  %1557 = vmatpush.msra.mxu3 %v328_v2  ;;  %v322_v8 = vld [vmem:[#allocation4 + $0x120] sm:$0xff]  ;;  %v1990_v9 = vld [vmem:[#allocation4 + $0x130] sm:$0xff]  ;;  %v319_v11 = vld [vmem:[#allocation4 + $0x108] sm:$0xff]  ;;  %s1545_s13 = sshll.u32 (%p1938_p0), %s1805_s18, 4  ;;  %s1546_s15 = sshll.u32 (%p1938_p0), %s1809_s19, 6 }
  0x32   : > { %465 = vmatpush.msra.mxu2 %v1979_v3  ;;  %399 = vmatpush.msra.mxu1 %v1982_v5  ;;  %v1992_v10 = vld [vmem:[#allocation4 + $0x140] sm:$0xff]  ;;  %v1996_v12 = vld [vmem:[#allocation4 + $0x118] sm:$0xff]  ;;  %v1998_v13 = vld [vmem:[#allocation4 + $0x128] sm:$0xff]  ;;  %s838_s23 = sadd.s32 (%p1938_p0), %s1546_s15, %s1545_s13  ;;  %s2629_s7 = sld [smem:[#allocation13_spill]] (%p1938_p0) }
  0x33   : > { %336 = vmatpush.msra.mxu0 %v325_v4  ;;  %1558 = vmatpush.msra.mxu3 %v325_v4  ;;  %v316_v14 = vld [vmem:[#allocation4 + $0xf0] sm:$0xff]  ;;  %v2002_v15 = vld [vmem:[#allocation4 + $0x100] sm:$0xff]  ;;  %v313_v17 = vld [vmem:[#allocation4 + $0xd8] sm:$0xff]  ;;  %s1547_s30 = sshll.u32 (%p1938_p0), %s838_s23, 3 }
  0x34   : > { %466 = vmatpush.msra.mxu2 %v1984_v6  ;;  %400 = vmatpush.msra.mxu1 %v1986_v7  ;;  %v2004_v16 = vld [vmem:[#allocation4 + $0x110] sm:$0xff]  ;;  %v2008_v18 = vld [vmem:[#allocation4 + $0xe8] sm:$0xff]  ;;  %v2010_v19 = vld [vmem:[#allocation4 + $0xf8] sm:$0xff] }
  0x35   : > { %337 = vmatpush.msra.mxu0 %v322_v8  ;;  %1559 = vmatpush.msra.mxu3 %v322_v8  ;;  %v310_v20 = vld [vmem:[#allocation4 + $0xc0] sm:$0xff]  ;;  %v2014_v21 = vld [vmem:[#allocation4 + $0xd0] sm:$0xff]  ;;  %v307_v23 = vld [vmem:[#allocation4 + $0xa8] sm:$0xff] }
  0x36   : > { %467 = vmatpush.msra.mxu2 %v1990_v9  ;;  %401 = vmatpush.msra.mxu1 %v1992_v10  ;;  %v2016_v22 = vld [vmem:[#allocation4 + $0xe0] sm:$0xff]  ;;  %v2020_v24 = vld [vmem:[#allocation4 + $0xb8] sm:$0xff]  ;;  %v2022_v25 = vld [vmem:[#allocation4 + $0xc8] sm:$0xff] }
  0x37   : > { %338 = vmatpush.msra.mxu0 %v319_v11  ;;  %1560 = vmatpush.msra.mxu3 %v319_v11  ;;  %v304_v26 = vld [vmem:[#allocation4 + $0x90] sm:$0xff]  ;;  %v2026_v27 = vld [vmem:[#allocation4 + $0xa0] sm:$0xff]  ;;  %v301_v29 = vld [vmem:[#allocation4 + $0x78] sm:$0xff] }
  0x38   : > { %468 = vmatpush.msra.mxu2 %v1996_v12  ;;  %402 = vmatpush.msra.mxu1 %v1998_v13  ;;  %v2028_v28 = vld [vmem:[#allocation4 + $0xb0] sm:$0xff]  ;;  %v2032_v30 = vld [vmem:[#allocation4 + $0x88] sm:$0xff]  ;;  %v2034_v31 = vld [vmem:[#allocation4 + $0x98] sm:$0xff]  ;;  %s2377_s25 = scalar_lea.vmem (%p1938_p0), %s2629_s7, %s1547_s30 }
  0x39   : > { %339 = vmatpush.msra.mxu0 %v316_v14  ;;  %1561 = vmatpush.msra.mxu3 %v316_v14  ;;  %v298_v32 = vld [vmem:[#allocation4 + $0x60] sm:$0xff]  ;;  %v2038_v33 = vld [vmem:[#allocation4 + $0x70] sm:$0xff]  ;;  %v295_v35 = vld [vmem:[#allocation4 + $0x48] sm:$0xff] }
  0x3a   : > { %469 = vmatpush.msra.mxu2 %v2002_v15  ;;  %403 = vmatpush.msra.mxu1 %v2004_v16  ;;  %v2040_v34 = vld [vmem:[#allocation4 + $0x80] sm:$0xff]  ;;  %v2044_v36 = vld [vmem:[#allocation4 + $0x58] sm:$0xff]  ;;  %v299_v37 = vld [vmem:[#allocation4 + $0x68] sm:$0xff] }
  0x3b   : > { %340 = vmatpush.msra.mxu0 %v313_v17  ;;  %1562 = vmatpush.msra.mxu3 %v313_v17  ;;  %v292_v38 = vld [vmem:[#allocation4 + $0x30] sm:$0xff]  ;;  %v2048_v39 = vld [vmem:[#allocation4 + $0x40] sm:$0xff]  ;;  %v289_v41 = vld [vmem:[#allocation4 + $0x18] sm:$0xff] }
  0x3c   : > { %470 = vmatpush.msra.mxu2 %v2008_v18  ;;  %404 = vmatpush.msra.mxu1 %v2010_v19  ;;  %v296_v40 = vld [vmem:[#allocation4 + $0x50] sm:$0xff]  ;;  %v2051_v42 = vld [vmem:[#allocation4 + $0x28] sm:$0xff]  ;;  %v293_v43 = vld [vmem:[#allocation4 + $0x38] sm:$0xff] }
  0x3d   : > { %341 = vmatpush.msra.mxu0 %v310_v20  ;;  %1563 = vmatpush.msra.mxu3 %v310_v20  ;;  %v286_v44 = vld [vmem:[#allocation4] sm:$0xff]  ;;  %v2054_v45 = vld [vmem:[#allocation4 + $0x10] sm:$0xff]  ;;  %v287_v49 = vld [vmem:[#allocation4 + $0x8] sm:$0xff] }
  0x3e   : > { %471 = vmatpush.msra.mxu2 %v2014_v21  ;;  %405 = vmatpush.msra.mxu1 %v2016_v22  ;;  %v270_v46 = vld [vmem:[%s1967_s9] sm:$0xff]  ;;  %v2066_v50 = vld [vmem:[%s1967_s9 + $0x68] sm:$0xff]  ;;  %v2075_v52 = vld [vmem:[%s1967_s9 + $0x70] sm:$0xff] }
  0x3f   : > { %342 = vmatpush.msra.mxu0 %v307_v23  ;;  %1564 = vmatpush.msra.mxu3 %v307_v23  ;;  %v2059_v47 = vld [vmem:[%s1967_s9 + $0x60] sm:$0xff]  ;;  %v271_v51 = vld [vmem:[%s1967_s9 + $0x8] sm:$0xff]  ;;  %v272_v53 = vld [vmem:[%s1967_s9 + $0x10] sm:$0xff] }
  0x40   : > { %472 = vmatpush.msra.mxu2 %v2020_v24  ;;  %406 = vmatpush.msra.mxu1 %v2022_v25  ;;  %v290_v48 = vld [vmem:[#allocation4 + $0x20] sm:$0xff]  ;;  %v273_v54 = vld [vmem:[%s1967_s9 + $0x18] sm:$0xff]  ;;  %v275_v57 = vld [vmem:[%s1967_s9 + $0x28] sm:$0xff] }
  0x41   : > { %343 = vmatpush.msra.mxu0 %v304_v26  ;;  %1565 = vmatpush.msra.mxu3 %v304_v26  ;;  %v2085_v55 = vld [vmem:[%s1967_s9 + $0x78] sm:$0xff]  ;;  %v274_v56 = vld [vmem:[%s1967_s9 + $0x20] sm:$0xff]  ;;  %v276_v58 = vld [vmem:[%s1967_s9 + $0x30] sm:$0xff] }
  0x42   : > { %473 = vmatpush.msra.mxu2 %v2026_v27  ;;  %407 = vmatpush.msra.mxu1 %v2028_v28  ;;  %v277_v59 = vld [vmem:[%s1967_s9 + $0x38] sm:$0xff]  ;;  %v278_v60 = vld [vmem:[%s1967_s9 + $0x40] sm:$0xff]  ;;  %v279_v61 = vld [vmem:[%s1967_s9 + $0x48] sm:$0xff] }
  0x43   : > { %344 = vmatpush.msra.mxu0 %v301_v29  ;;  %1566 = vmatpush.msra.mxu3 %v301_v29  ;;  %v280_v62 = vld [vmem:[%s1967_s9 + $0x50] sm:$0xff]  ;;  %v281_v63 = vld [vmem:[%s1967_s9 + $0x58] sm:$0xff] }
  0x44   : > { %474 = vmatpush.msra.mxu2 %v2032_v30  ;;  %408 = vmatpush.msra.mxu1 %v2034_v31 }
  0x45   : > { %345 = vmatpush.msra.mxu0 %v298_v32  ;;  %1567 = vmatpush.msra.mxu3 %v298_v32 }
  0x46   : > { %475 = vmatpush.msra.mxu2 %v2038_v33  ;;  %409 = vmatpush.msra.mxu1 %v2040_v34 }
  0x47   : > { %346 = vmatpush.msra.mxu0 %v295_v35  ;;  %1568 = vmatpush.msra.mxu3 %v295_v35 }
  0x48   : > { %476 = vmatpush.msra.mxu2 %v2044_v36  ;;  %410 = vmatpush.msra.mxu1 %v299_v37 }
  0x49   : > { %347 = vmatpush.msra.mxu0 %v292_v38  ;;  %1569 = vmatpush.msra.mxu3 %v292_v38 }
  0x4a   : > { %477 = vmatpush.msra.mxu2 %v2048_v39  ;;  %411 = vmatpush.msra.mxu1 %v296_v40 }
  0x4b   : > { %348 = vmatpush.msra.mxu0 %v289_v41  ;;  %1570 = vmatpush.msra.mxu3 %v289_v41 }
  0x4c   : > { %478 = vmatpush.msra.mxu2 %v2051_v42  ;;  %412 = vmatpush.msra.mxu1 %v293_v43 }
  0x4d   : > { %349 = vmatpush.msra.mxu0 %v286_v44  ;;  %1571 = vmatpush.msra.mxu3 %v286_v44 }
  0x4e   : > { %479 = vmatpush.msra.mxu2 %v2054_v45  ;;  %350 = vmatmul.f32.vlgmr.msra.gmra.mxu0 %v270_v46 }
  0x4f   : > { %386 = vmatmul.f32.vlgmr.msra.gmra.mxu3 %v2059_v47  ;;  %480 = vmatmul.f32.vlgmr.msra.gmra.mxu2 %v270_v46 }
  0x50   : > { %413 = vmatpush.msra.mxu1 %v290_v48  ;;  %1572 = vmatpush.msrb.mxu3 %v1982_v5 }
  0x52   : > { %414 = vmatpush.msra.mxu1 %v287_v49  ;;  %1573 = vmatpush.msrb.mxu3 %v1986_v7 }
  0x53   : > { %415 = vmatmul.f32.vlgmr.msra.gmra.mxu1 %v270_v46 }
  0x54   : > { %1574 = vmatpush.msrb.mxu3 %v1992_v10 }
  0x56   : > { %353 = vmatmul.f32.gmra.mxu0 %v271_v51  ;;  %1575 = vmatpush.msrb.mxu3 %v1998_v13 }
  0x57   : > { %389 = vmatmul.f32.gmra.mxu3 %v2066_v50  ;;  %483 = vmatmul.f32.gmra.mxu2 %v271_v51 }
  0x58   : > { %1576 = vmatpush.msrb.mxu3 %v2004_v16 }
  0x5a   : > { %1577 = vmatpush.msrb.mxu3 %v2010_v19 }
  0x5b   : > { %418 = vmatmul.f32.gmra.mxu1 %v271_v51 }
  0x5c   : > { %1578 = vmatpush.msrb.mxu3 %v2016_v22 }
  0x5e   : > { %356 = vmatmul.f32.gmra.mxu0 %v272_v53  ;;  %1579 = vmatpush.msrb.mxu3 %v2022_v25 }
  0x5f   : > { %392 = vmatmul.f32.gmra.mxu3 %v2075_v52  ;;  %486 = vmatmul.f32.gmra.mxu2 %v272_v53 }
  0x60   : > { %1580 = vmatpush.msrb.mxu3 %v2028_v28 }
  0x62   : > { %1581 = vmatpush.msrb.mxu3 %v2034_v31 }
  0x63   : > { %421 = vmatmul.f32.gmra.mxu1 %v272_v53 }
  0x64   : > { %1582 = vmatpush.msrb.mxu3 %v2040_v34 }
  0x66   : > { %359 = vmatmul.f32.gmra.mxu0 %v273_v54  ;;  %1583 = vmatpush.msrb.mxu3 %v299_v37 }
  0x67   : > { %489 = vmatmul.f32.gmra.mxu2 %v273_v54  ;;  %395 = vmatmul.f32.gmra.mxu3 %v2085_v55 }
  0x68   : > { %1584 = vmatpush.msrb.mxu3 %v296_v40 }
  0x6a   : > { %1585 = vmatpush.msrb.mxu3 %v293_v43 }
  0x6b   : > { %424 = vmatmul.f32.gmra.mxu1 %v273_v54 }
  0x6c   : > { %1586 = vmatpush.msrb.mxu3 %v290_v48 }
  0x6e   : > { %362 = vmatmul.f32.gmra.mxu0 %v274_v56  ;;  %1587 = vmatpush.msrb.mxu3 %v287_v49 }
  0x6f   : > { %492 = vmatmul.f32.gmra.mxu2 %v274_v56  ;;  %451 = vmatmul.f32.vlgmr.msrb.gmra.mxu3 %v2059_v47 }
  0x70   : > { %1588 = vmatpush.msra.mxu3 %v1977_v1 }
  0x72   : > { %1589 = vmatpush.msra.mxu3 %v1979_v3 }
  0x73   : > { %427 = vmatmul.f32.gmra.mxu1 %v274_v56 }
  0x74   : > { %1590 = vmatpush.msra.mxu3 %v1984_v6 }
  0x76   : > { %365 = vmatmul.f32.gmra.mxu0 %v275_v57  ;;  %1591 = vmatpush.msra.mxu3 %v1990_v9 }
  0x77   : > { %454 = vmatmul.f32.gmra.mxu3 %v2066_v50  ;;  %495 = vmatmul.f32.gmra.mxu2 %v275_v57 }
  0x78   : > { %1592 = vmatpush.msra.mxu3 %v1996_v12 }
  0x7a   : > { %1593 = vmatpush.msra.mxu3 %v2002_v15 }
  0x7b   : > { %430 = vmatmul.f32.gmra.mxu1 %v275_v57 }
  0x7c   : > { %1594 = vmatpush.msra.mxu3 %v2008_v18 }
  0x7e   : > { %368 = vmatmul.f32.gmra.mxu0 %v276_v58  ;;  %1595 = vmatpush.msra.mxu3 %v2014_v21 }
  0x7f   : > { %498 = vmatmul.f32.gmra.mxu2 %v276_v58  ;;  %457 = vmatmul.f32.gmra.mxu3 %v2075_v52 }
  0x80   : > { %1596 = vmatpush.msra.mxu3 %v2020_v24 }
  0x82   : > { %1597 = vmatpush.msra.mxu3 %v2026_v27 }
  0x83   : > { %433 = vmatmul.f32.gmra.mxu1 %v276_v58 }
  0x84   : > { %1598 = vmatpush.msra.mxu3 %v2032_v30 }
  0x86   : > { %371 = vmatmul.f32.gmra.mxu0 %v277_v59  ;;  %1599 = vmatpush.msra.mxu3 %v2038_v33 }
  0x87   : > { %501 = vmatmul.f32.gmra.mxu2 %v277_v59  ;;  %460 = vmatmul.f32.gmra.mxu3 %v2085_v55 }
  0x88   : > { %1600 = vmatpush.msra.mxu3 %v2044_v36 }
  0x8a   : > { %1601 = vmatpush.msra.mxu3 %v2048_v39 }
  0x8b   : > { %436 = vmatmul.f32.gmra.mxu1 %v277_v59 }
  0x8c   : > { %1602 = vmatpush.msra.mxu3 %v2051_v42 }
  0x8e   : > { %374 = vmatmul.f32.gmra.mxu0 %v278_v60  ;;  %1603 = vmatpush.msra.mxu3 %v2054_v45 }
  0x8f   : > { %504 = vmatmul.f32.gmra.mxu2 %v278_v60  ;;  %516 = vmatmul.f32.vlgmr.msra.gmra.mxu3 %v2059_v47 }
  0x93   : > { %439 = vmatmul.f32.gmra.mxu1 %v278_v60 }
  0x96   : > { %377 = vmatmul.f32.gmra.mxu0 %v279_v61 }
  0x97   : > { %507 = vmatmul.f32.gmra.mxu2 %v279_v61  ;;  %519 = vmatmul.f32.gmra.mxu3 %v2066_v50 }
  0x9b   : > { %442 = vmatmul.f32.gmra.mxu1 %v279_v61 }
  0x9e   : > { %380 = vmatmul.f32.gmra.mxu0 %v280_v62 }
  0x9f   : > { %510 = vmatmul.f32.gmra.mxu2 %v280_v62  ;;  %522 = vmatmul.f32.gmra.mxu3 %v2075_v52 }
  0xa3   : > { %445 = vmatmul.f32.gmra.mxu1 %v280_v62 }
  0xa6   : > { %383 = vmatmul.f32.gmra.mxu0 %v281_v63 }
  0xa7   : > { %513 = vmatmul.f32.gmra.mxu2 %v281_v63  ;;  %525 = vmatmul.f32.gmra.mxu3 %v2085_v55 }
  0xab   : > { %448 = vmatmul.f32.gmra.mxu1 %v281_v63 }
  0xcb   : > { %v351_v0 = vpop.f32.mrf.mxu0 }
  0xcc   : > { %530 = vst.msk [vmem:[%s2122_s3] sm:$0xff] %vm529_vm0, %v351_v0  ;;  %594 = vrot.lane.b32.xlu0 %v351_v0, %s1828_s24 }
  0xd0   : > { %v416_v1 = vpop.f32.mrf.mxu1 }
  0xd1   : > { %546 = vst.msk [vmem:[%s2127_s26] sm:$0xff] %vm529_vm0, %v416_v1  ;;  %675 = vrot.lane.b32.xlu1 %v416_v1, %s1828_s24 }
  0xd2   : > { %v387_v2 = vpop.f32.mrf.mxu3  ;;  %v481_v3 = vpop.f32.mrf.mxu2 }
  0xd3   : > { %542 = vst.msk [vmem:[%s2122_s3 + $0x60] sm:$0xff] %vm529_vm0, %v387_v2  ;;  %756 = vrot.lane.b32.xlu2 %v481_v3, %s1828_s24  ;;  %v354_v4 = vpop.f32.mrf.mxu0 }
  0xd4   : > { %562 = vst.msk [vmem:[%s2135_s27] sm:$0xff] %vm529_vm0, %v481_v3  ;;  %618 = vrot.lane.b32.xlu0 %v387_v2, %s1828_s24 }
  0xd5   : > { %531 = vst.msk [vmem:[%s2122_s3 + $0x8] sm:$0xff] %vm529_vm0, %v354_v4 }
  0xd8   : > { %v419_v5 = vpop.f32.mrf.mxu1 }
  0xd9   : > { %547 = vst.msk [vmem:[%s2127_s26 + $0x8] sm:$0xff] %vm529_vm0, %v419_v5 }
  0xda   : > { %v390_v6 = vpop.f32.mrf.mxu3  ;;  %v484_v7 = vpop.f32.mrf.mxu2 }
  0xdb   : > { %543 = vst.msk [vmem:[%s2122_s3 + $0x68] sm:$0xff] %vm529_vm0, %v390_v6  ;;  %620 = vrot.lane.b32.xlu1 %v390_v6, %s1828_s24  ;;  %677 = vrot.lane.b32.xlu2 %v419_v5, %s1828_s24  ;;  %v357_v8 = vpop.f32.mrf.mxu0 }
  0xdc   : > { %563 = vst.msk [vmem:[%s2135_s27 + $0x8] sm:$0xff] %vm529_vm0, %v484_v7  ;;  %596 = vrot.lane.b32.xlu0 %v354_v4, %s1828_s24 }
  0xdd   : > { %532 = vst.msk [vmem:[%s2122_s3 + $0x10] sm:$0xff] %vm529_vm0, %v357_v8 }
  0xe0   : > { %v422_v9 = vpop.f32.mrf.mxu1 }
  0xe1   : > { %548 = vst.msk [vmem:[%s2127_s26 + $0x10] sm:$0xff] %vm529_vm0, %v422_v9 }
  0xe2   : > { %v393_v10 = vpop.f32.mrf.mxu3  ;;  %v487_v11 = vpop.f32.mrf.mxu2 }
  0xe3   : > { %544 = vst.msk [vmem:[%s2122_s3 + $0x70] sm:$0xff] %vm529_vm0, %v393_v10  ;;  %622 = vrot.lane.b32.xlu2 %v393_v10, %s1828_s24  ;;  %598 = vrot.lane.b32.xlu1 %v357_v8, %s1828_s24  ;;  %v360_v12 = vpop.f32.mrf.mxu0 }
  0xe4   : > { %564 = vst.msk [vmem:[%s2135_s27 + $0x10] sm:$0xff] %vm529_vm0, %v487_v11  ;;  %758 = vrot.lane.b32.xlu0 %v484_v7, %s1828_s24 }
  0xe5   : > { %533 = vst.msk [vmem:[%s2122_s3 + $0x18] sm:$0xff] %vm529_vm0, %v360_v12 }
  0xe8   : > { %v425_v13 = vpop.f32.mrf.mxu1 }
  0xe9   : > { %549 = vst.msk [vmem:[%s2127_s26 + $0x18] sm:$0xff] %vm529_vm0, %v425_v13 }
  0xea   : > { %v490_v14 = vpop.f32.mrf.mxu2  ;;  %v396_v15 = vpop.f32.mrf.mxu3 }
  0xeb   : > { %565 = vst.msk [vmem:[%s2135_s27 + $0x18] sm:$0xff] %vm529_vm0, %v490_v14  ;;  %762 = vrot.lane.b32.xlu2 %v490_v14, %s1828_s24  ;;  %760 = vrot.lane.b32.xlu1 %v487_v11, %s1828_s24  ;;  %v363_v16 = vpop.f32.mrf.mxu0 }
  0xec   : > { %679 = vrot.lane.b32.xlu0 %v422_v9, %s1828_s24  ;;  %534 = vst.msk [vmem:[%s2122_s3 + $0x20] sm:$0xff] %vm529_vm0, %v363_v16 }
  0xed   : > { %545 = vst.msk [vmem:[%s2122_s3 + $0x78] sm:$0xff] %vm529_vm0, %v396_v15 }
  0xf0   : > { %v428_v17 = vpop.f32.mrf.mxu1 }
  0xf1   : > { %550 = vst.msk [vmem:[%s2127_s26 + $0x20] sm:$0xff] %vm529_vm0, %v428_v17 }
  0xf2   : > { %v493_v18 = vpop.f32.mrf.mxu2  ;;  %v452_v19 = vpop.f32.mrf.mxu3 }
  0xf3   : > { %600 = vrot.lane.b32.xlu1 %v360_v12, %s1828_s24  ;;  %602 = vrot.lane.b32.xlu2 %v363_v16, %s1828_s24  ;;  %566 = vst.msk [vmem:[%s2135_s27 + $0x20] sm:$0xff] %vm529_vm0, %v493_v18  ;;  %v366_v20 = vpop.f32.mrf.mxu0 }
  0xf4   : > { %624 = vrot.lane.b32.xlu0 %v396_v15, %s1828_s24  ;;  %535 = vst.msk [vmem:[%s2122_s3 + $0x28] sm:$0xff] %vm529_vm0, %v366_v20 }
  0xf5   : > { %558 = vst.msk [vmem:[%s2127_s26 + $0x60] sm:$0xff] %vm529_vm0, %v452_v19 }
  0xf8   : > { %v431_v21 = vpop.f32.mrf.mxu1 }
  0xf9   : > { %551 = vst.msk [vmem:[%s2127_s26 + $0x28] sm:$0xff] %vm529_vm0, %v431_v21 }
  0xfa   : > { %v455_v22 = vpop.f32.mrf.mxu3  ;;  %v496_v23 = vpop.f32.mrf.mxu2 }
  0xfb   : > { %681 = vrot.lane.b32.xlu1 %v425_v13, %s1828_s24  ;;  %683 = vrot.lane.b32.xlu2 %v428_v17, %s1828_s24  ;;  %559 = vst.msk [vmem:[%s2127_s26 + $0x68] sm:$0xff] %vm529_vm0, %v455_v22  ;;  %v369_v24 = vpop.f32.mrf.mxu0 }
  0xfc   : > { %764 = vrot.lane.b32.xlu0 %v493_v18, %s1828_s24  ;;  %567 = vst.msk [vmem:[%s2135_s27 + $0x28] sm:$0xff] %vm529_vm0, %v496_v23 }
  0xfd   : > { %536 = vst.msk [vmem:[%s2122_s3 + $0x30] sm:$0xff] %vm529_vm0, %v369_v24 }
 0x100   : > { %v434_v25 = vpop.f32.mrf.mxu1 }
 0x101   : > { %552 = vst.msk [vmem:[%s2127_s26 + $0x30] sm:$0xff] %vm529_vm0, %v434_v25 }
 0x102   : > { %v499_v26 = vpop.f32.mrf.mxu2  ;;  %v458_v27 = vpop.f32.mrf.mxu3 }
 0x103   : > { %699 = vrot.lane.b32.xlu1 %v452_v19, %s1828_s24  ;;  %604 = vrot.lane.b32.xlu2 %v366_v20, %s1828_s24  ;;  %568 = vst.msk [vmem:[%s2135_s27 + $0x30] sm:$0xff] %vm529_vm0, %v499_v26  ;;  %v372_v28 = vpop.f32.mrf.mxu0 }
 0x104   : > { %685 = vrot.lane.b32.xlu0 %v431_v21, %s1828_s24  ;;  %560 = vst.msk [vmem:[%s2127_s26 + $0x70] sm:$0xff] %vm529_vm0, %v458_v27 }
 0x105   : > { %537 = vst.msk [vmem:[%s2122_s3 + $0x38] sm:$0xff] %vm529_vm0, %v372_v28 }
 0x108   : > { %v437_v29 = vpop.f32.mrf.mxu1 }
 0x109   : > { %553 = vst.msk [vmem:[%s2127_s26 + $0x38] sm:$0xff] %vm529_vm0, %v437_v29 }
 0x10a   : > { %v502_v30 = vpop.f32.mrf.mxu2  ;;  %v461_v31 = vpop.f32.mrf.mxu3 }
 0x10b   : > { %766 = vrot.lane.b32.xlu1 %v496_v23, %s1828_s24  ;;  %701 = vrot.lane.b32.xlu2 %v455_v22, %s1828_s24  ;;  %569 = vst.msk [vmem:[%s2135_s27 + $0x38] sm:$0xff] %vm529_vm0, %v502_v30  ;;  %v375_v32 = vpop.f32.mrf.mxu0 }
 0x10c   : > { %606 = vrot.lane.b32.xlu0 %v369_v24, %s1828_s24  ;;  %538 = vst.msk [vmem:[%s2122_s3 + $0x40] sm:$0xff] %vm529_vm0, %v375_v32 }
 0x10d   : > { %561 = vst.msk [vmem:[%s2127_s26 + $0x78] sm:$0xff] %vm529_vm0, %v461_v31 }
 0x110   : > { %v440_v33 = vpop.f32.mrf.mxu1 }
 0x111   : > { %554 = vst.msk [vmem:[%s2127_s26 + $0x40] sm:$0xff] %vm529_vm0, %v440_v33 }
 0x112   : > { %v505_v34 = vpop.f32.mrf.mxu2  ;;  %v517_v35 = vpop.f32.mrf.mxu3 }
 0x113   : > { %687 = vrot.lane.b32.xlu1 %v434_v25, %s1828_s24  ;;  %768 = vrot.lane.b32.xlu2 %v499_v26, %s1828_s24  ;;  %570 = vst.msk [vmem:[%s2135_s27 + $0x40] sm:$0xff] %vm529_vm0, %v505_v34  ;;  %v378_v36 = vpop.f32.mrf.mxu0 }
 0x114   : > { %703 = vrot.lane.b32.xlu0 %v458_v27, %s1828_s24  ;;  %574 = vst.msk [vmem:[%s2135_s27 + $0x60] sm:$0xff] %vm529_vm0, %v517_v35 }
 0x115   : > { %539 = vst.msk [vmem:[%s2122_s3 + $0x48] sm:$0xff] %vm529_vm0, %v378_v36 }
 0x118   : > { %v443_v37 = vpop.f32.mrf.mxu1 }
 0x119   : > { %555 = vst.msk [vmem:[%s2127_s26 + $0x48] sm:$0xff] %vm529_vm0, %v443_v37 }
 0x11a   : > { %v508_v38 = vpop.f32.mrf.mxu2  ;;  %v520_v40 = vpop.f32.mrf.mxu3 }
 0x11b   : > { %689 = vrot.lane.b32.xlu2 %v437_v29, %s1828_s24  ;;  %608 = vrot.lane.b32.xlu1 %v372_v28, %s1828_s24  ;;  %571 = vst.msk [vmem:[%s2135_s27 + $0x48] sm:$0xff] %vm529_vm0, %v508_v38  ;;  %v381_v39 = vpop.f32.mrf.mxu0 }
 0x11c   : > { %770 = vrot.lane.b32.xlu0 %v502_v30, %s1828_s24  ;;  %540 = vst.msk [vmem:[%s2122_s3 + $0x50] sm:$0xff] %vm529_vm0, %v381_v39 }
 0x11d   : > { %575 = vst.msk [vmem:[%s2135_s27 + $0x68] sm:$0xff] %vm529_vm0, %v520_v40 }
 0x120   : > { %v446_v41 = vpop.f32.mrf.mxu1 }
 0x121   : > { %556 = vst.msk [vmem:[%s2127_s26 + $0x50] sm:$0xff] %vm529_vm0, %v446_v41 }
 0x122   : > { %v511_v42 = vpop.f32.mrf.mxu2  ;;  %v523_v43 = vpop.f32.mrf.mxu3 }
 0x123   : > { %705 = vrot.lane.b32.xlu1 %v461_v31, %s1828_s24  ;;  %610 = vrot.lane.b32.xlu2 %v375_v32, %s1828_s24  ;;  %572 = vst.msk [vmem:[%s2135_s27 + $0x50] sm:$0xff] %vm529_vm0, %v511_v42  ;;  %v384_v48 = vpop.f32.mrf.mxu0  ;;  %v931_v32 = vld [vmem:[%s2122_s3] sm:$0xff] (%p1938_p0) }
 0x124   : > { %691 = vrot.lane.b32.xlu0 %v440_v33, %s1828_s24  ;;  %576 = vst.msk [vmem:[%s2135_s27 + $0x70] sm:$0xff] %vm529_vm0, %v523_v43  ;;  %v933_v33 = vld [vmem:[%s2122_s3 + $0x8] sm:$0xff] (%p1938_p0) }
 0x125   : > { %541 = vst.msk [vmem:[%s2122_s3 + $0x58] sm:$0xff] %vm529_vm0, %v384_v48 }
 0x126   : > { %932 = vst [vmem:[%s2377_s25] sm:$0xff] (%p1938_p0), %v931_v32 }
 0x127   : > { %934 = vst [vmem:[%s2377_s25 + $0x8] sm:$0xff] (%p1938_p0), %v933_v33 }
 0x128   : > { %v449_v44 = vpop.f32.mrf.mxu1 }
 0x129   : > { %557 = vst.msk [vmem:[%s2127_s26 + $0x58] sm:$0xff] %vm529_vm0, %v449_v44 }
 0x12a   : > { %v514_v45 = vpop.f32.mrf.mxu2  ;;  %v526_v51 = vpop.f32.mrf.mxu3 }
 0x12b   : > { %772 = vrot.lane.b32.xlu1 %v505_v34, %s1828_s24  ;;  %780 = vrot.lane.b32.xlu2 %v517_v35, %s1828_s24  ;;  %573 = vst.msk [vmem:[%s2135_s27 + $0x58] sm:$0xff] %vm529_vm0, %v514_v45  ;;  %v935_v34 = vld [vmem:[%s2122_s3 + $0x10] sm:$0xff] (%p1938_p0) }
 0x12c   : > { %612 = vrot.lane.b32.xlu0 %v378_v36, %s1828_s24  ;;  %577 = vst.msk [vmem:[%s2135_s27 + $0x78] sm:$0xff] %vm529_vm0, %v526_v51  ;;  %v937_v35 = vld [vmem:[%s2122_s3 + $0x18] sm:$0xff] (%p1938_p0)  ;;  %v939_v36 = vld [vmem:[%s2122_s3 + $0x20] sm:$0xff] (%p1938_p0) }
 0x12d   : > { %v757_v46 = vpop.permute.xlu2 %756  ;;  %936 = vst [vmem:[%s2377_s25 + $0x10] sm:$0xff] (%p1938_p0), %v935_v34 }
 0x12e   : > { %1526 = vst.msk [vmem:[%s2135_s27 + $0x80] sm:$0xff] %vm529_vm0, %v757_v46  ;;  %v959_v46 = vld [vmem:[%s2122_s3 + $0x70] sm:$0xff] (%p1938_p0) }
 0x12f   : > { %938 = vst [vmem:[%s2377_s25 + $0x18] sm:$0xff] (%p1938_p0), %v937_v35 }
 0x130   : > { %940 = vst [vmem:[%s2377_s25 + $0x20] sm:$0xff] (%p1938_p0), %v939_v36 }
 0x131   : > { %960 = vst [vmem:[%s2377_s25 + $0x70] sm:$0xff] (%p1938_p0), %v959_v46 }
 0x133   : > { %693 = vrot.lane.b32.xlu1 %v443_v37, %s1828_s24  ;;  %774 = vrot.lane.b32.xlu2 %v508_v38, %s1828_s24  ;;  %v941_v37 = vld [vmem:[%s2122_s3 + $0x28] sm:$0xff] (%p1938_p0)  ;;  %v943_v38 = vld [vmem:[%s2122_s3 + $0x30] sm:$0xff] (%p1938_p0) }
 0x134   : > { %776 = vrot.lane.b32.xlu0 %v511_v42, %s1828_s24  ;;  %942 = vst [vmem:[%s2377_s25 + $0x28] sm:$0xff] (%p1938_p0), %v941_v37  ;;  %v951_v42 = vld [vmem:[%s2122_s3 + $0x50] sm:$0xff] (%p1938_p0) }
 0x135   : > { %v678_v47 = vpop.permute.xlu2 %677  ;;  %944 = vst [vmem:[%s2377_s25 + $0x30] sm:$0xff] (%p1938_p0), %v943_v38 }
 0x136   : > { %1511 = vst.msk [vmem:[%s2127_s26 + $0x88] sm:$0xff] %vm529_vm0, %v678_v47  ;;  %v961_v47 = vld [vmem:[%s2122_s3 + $0x78] sm:$0xff] (%p1938_p0) }
 0x137   : > { %952 = vst [vmem:[%s2377_s25 + $0x50] sm:$0xff] (%p1938_p0), %v951_v42 }
 0x138   : > { %962 = vst [vmem:[%s2377_s25 + $0x78] sm:$0xff] (%p1938_p0), %v961_v47 }
 0x13b   : > { %695 = vrot.lane.b32.xlu2 %v446_v41, %s1828_s24  ;;  %614 = vrot.lane.b32.xlu1 %v381_v39, %s1828_s24  ;;  %v945_v39 = vld [vmem:[%s2122_s3 + $0x38] sm:$0xff] (%p1938_p0)  ;;  %v949_v41 = vld [vmem:[%s2122_s3 + $0x48] sm:$0xff] (%p1938_p0) }
 0x13c   : > { %697 = vrot.lane.b32.xlu0 %v449_v44, %s1828_s24  ;;  %946 = vst [vmem:[%s2377_s25 + $0x38] sm:$0xff] (%p1938_p0), %v945_v39  ;;  %v955_v44 = vld [vmem:[%s2122_s3 + $0x60] sm:$0xff] (%p1938_p0) }
 0x13d   : > { %v623_v49 = vpop.permute.xlu2 %622  ;;  %950 = vst [vmem:[%s2377_s25 + $0x48] sm:$0xff] (%p1938_p0), %v949_v41 }
 0x13e   : > { %1508 = vst.msk [vmem:[%s2122_s3 + $0xf0] sm:$0xff] %vm529_vm0, %v623_v49  ;;  %v595_v50 = vpop.permute.xlu0 %594 }
 0x13f   : > { %1494 = vst.msk [vmem:[%s2122_s3 + $0x80] sm:$0xff] %vm529_vm0, %v595_v50 }
 0x140   : > { %956 = vst [vmem:[%s2377_s25 + $0x60] sm:$0xff] (%p1938_p0), %v955_v44 }
 0x143   : > { %778 = vrot.lane.b32.xlu1 %v514_v45, %s1828_s24  ;;  %v676_v52 = vpop.permute.xlu1 %675  ;;  %616 = vrot.lane.b32.xlu2 %v384_v48, %s1828_s24  ;;  %v957_v45 = vld [vmem:[%s2122_s3 + $0x68] sm:$0xff] (%p1938_p0) }
 0x144   : > { %1510 = vst.msk [vmem:[%s2127_s26 + $0x80] sm:$0xff] %vm529_vm0, %v676_v52  ;;  %782 = vrot.lane.b32.xlu0 %v520_v40, %s1828_s24  ;;  %v947_v40 = vld [vmem:[%s2122_s3 + $0x40] sm:$0xff] (%p1938_p0) }
 0x145   : > { %v763_v53 = vpop.permute.xlu2 %762  ;;  %948 = vst [vmem:[%s2377_s25 + $0x40] sm:$0xff] (%p1938_p0), %v947_v40 }
 0x146   : > { %1529 = vst.msk [vmem:[%s2135_s27 + $0x98] sm:$0xff] %vm529_vm0, %v763_v53  ;;  %v619_v54 = vpop.permute.xlu0 %618  ;;  %v963_v48 = vld [vmem:[%s2122_s3 + $0x80] sm:$0xff] (%p1938_p0) }
 0x147   : > { %1506 = vst.msk [vmem:[%s2122_s3 + $0xe0] sm:$0xff] %vm529_vm0, %v619_v54 }
 0x148   : > { %958 = vst [vmem:[%s2377_s25 + $0x68] sm:$0xff] (%p1938_p0), %v957_v45 }
 0x149   : > { %964 = vst [vmem:[%s2377_s25 + $0x100] sm:$0xff] (%p1938_p0), %v963_v48 }
 0x14b   : > { %784 = vrot.lane.b32.xlu1 %v523_v43, %s1828_s24  ;;  %786 = vrot.lane.b32.xlu2 %v526_v51, %s1828_s24  ;;  %v953_v43 = vld [vmem:[%s2122_s3 + $0x58] sm:$0xff] (%p1938_p0) }
 0x14c   : > { %954 = vst [vmem:[%s2377_s25 + $0x58] sm:$0xff] (%p1938_p0), %v953_v43 }
 0x14d   : > { %v621_v55 = vpop.permute.xlu1 %620  ;;  %v603_v56 = vpop.permute.xlu2 %602 }
 0x14e   : > { %1507 = vst.msk [vmem:[%s2122_s3 + $0xe8] sm:$0xff] %vm529_vm0, %v621_v55  ;;  %v597_v57 = vpop.permute.xlu0 %596 }
 0x14f   : > { %1498 = vst.msk [vmem:[%s2122_s3 + $0xa0] sm:$0xff] %vm529_vm0, %v603_v56 }
 0x150   : > { %1495 = vst.msk [vmem:[%s2122_s3 + $0x88] sm:$0xff] %vm529_vm0, %v597_v57 }
 0x155   : > { %v599_v58 = vpop.permute.xlu1 %598  ;;  %v684_v59 = vpop.permute.xlu2 %683 }
 0x156   : > { %1496 = vst.msk [vmem:[%s2122_s3 + $0x90] sm:$0xff] %vm529_vm0, %v599_v58  ;;  %v759_v60 = vpop.permute.xlu0 %758  ;;  %v971_v52 = vld [vmem:[%s2122_s3 + $0xa0] sm:$0xff] (%p1938_p0) }
 0x157   : > { %1514 = vst.msk [vmem:[%s2127_s26 + $0xa0] sm:$0xff] %vm529_vm0, %v684_v59  ;;  %v965_v49 = vld [vmem:[%s2122_s3 + $0x88] sm:$0xff] (%p1938_p0) }
 0x158   : > { %1527 = vst.msk [vmem:[%s2135_s27 + $0x88] sm:$0xff] %vm529_vm0, %v759_v60  ;;  %v987_v60 = vld [vmem:[%s2122_s3 + $0xe0] sm:$0xff] (%p1938_p0) }
 0x159   : > { %966 = vst [vmem:[%s2377_s25 + $0x108] sm:$0xff] (%p1938_p0), %v965_v49 }
 0x15a   : > { %972 = vst [vmem:[%s2377_s25 + $0x120] sm:$0xff] (%p1938_p0), %v971_v52 }
 0x15b   : > { %988 = vst [vmem:[%s2377_s25 + $0x160] sm:$0xff] (%p1938_p0), %v987_v60 }
 0x15d   : > { %v761_v61 = vpop.permute.xlu1 %760  ;;  %v605_v62 = vpop.permute.xlu2 %604  ;;  %v967_v50 = vld [vmem:[%s2122_s3 + $0x90] sm:$0xff] (%p1938_p0) }
 0x15e   : > { %1528 = vst.msk [vmem:[%s2135_s27 + $0x90] sm:$0xff] %vm529_vm0, %v761_v61  ;;  %v680_v63 = vpop.permute.xlu0 %679  ;;  %v989_v61 = vld [vmem:[%s2122_s3 + $0xe8] sm:$0xff] (%p1938_p0) }
 0x15f   : > { %1499 = vst.msk [vmem:[%s2122_s3 + $0xa8] sm:$0xff] %vm529_vm0, %v605_v62  ;;  %v991_v62 = vld [vmem:[%s2122_s3 + $0xf0] sm:$0xff] (%p1938_p0) }
 0x160   : > { %1512 = vst.msk [vmem:[%s2127_s26 + $0x90] sm:$0xff] %vm529_vm0, %v680_v63 }
 0x161   : > { %968 = vst [vmem:[%s2377_s25 + $0x110] sm:$0xff] (%p1938_p0), %v967_v50 }
 0x162   : > { %990 = vst [vmem:[%s2377_s25 + $0x168] sm:$0xff] (%p1938_p0), %v989_v61 }
 0x163   : > { %992 = vst [vmem:[%s2377_s25 + $0x170] sm:$0xff] (%p1938_p0), %v991_v62 }
 0x165   : > { %v601_v0 = vpop.permute.xlu1 %600  ;;  %v702_v1 = vpop.permute.xlu2 %701 }
 0x166   : > { %1497 = vst.msk [vmem:[%s2122_s3 + $0x98] sm:$0xff] %vm529_vm0, %v601_v0  ;;  %v625_v2 = vpop.permute.xlu0 %624  ;;  %v973_v53 = vld [vmem:[%s2122_s3 + $0xa8] sm:$0xff] (%p1938_p0) }
 0x167   : > { %1523 = vst.msk [vmem:[%s2127_s26 + $0xe8] sm:$0xff] %vm529_vm0, %v702_v1 }
 0x168   : > { %1509 = vst.msk [vmem:[%s2122_s3 + $0xf8] sm:$0xff] %vm529_vm0, %v625_v2 }
 0x169   : > { %974 = vst [vmem:[%s2377_s25 + $0x128] sm:$0xff] (%p1938_p0), %v973_v53 }
 0x16d   : > { %v682_v3 = vpop.permute.xlu1 %681  ;;  %v769_v4 = vpop.permute.xlu2 %768  ;;  %v969_v51 = vld [vmem:[%s2122_s3 + $0x98] sm:$0xff] (%p1938_p0) }
 0x16e   : > { %1513 = vst.msk [vmem:[%s2127_s26 + $0x98] sm:$0xff] %vm529_vm0, %v682_v3  ;;  %v765_v5 = vpop.permute.xlu0 %764 }
 0x16f   : > { %1532 = vst.msk [vmem:[%s2135_s27 + $0xb0] sm:$0xff] %vm529_vm0, %v769_v4  ;;  %v993_v63 = vld [vmem:[%s2122_s3 + $0xf8] sm:$0xff] (%p1938_p0) }
 0x170   : > { %1530 = vst.msk [vmem:[%s2135_s27 + $0xa0] sm:$0xff] %vm529_vm0, %v765_v5 }
 0x171   : > { %970 = vst [vmem:[%s2377_s25 + $0x118] sm:$0xff] (%p1938_p0), %v969_v51 }
 0x172   : > { %994 = vst [vmem:[%s2377_s25 + $0x178] sm:$0xff] (%p1938_p0), %v993_v63 }
 0x175   : > { %v700_v6 = vpop.permute.xlu1 %699  ;;  %v690_v7 = vpop.permute.xlu2 %689 }
 0x176   : > { %1522 = vst.msk [vmem:[%s2127_s26 + $0xe0] sm:$0xff] %vm529_vm0, %v700_v6  ;;  %v686_v8 = vpop.permute.xlu0 %685 }
 0x177   : > { %1517 = vst.msk [vmem:[%s2127_s26 + $0xb8] sm:$0xff] %vm529_vm0, %v690_v7 }
 0x178   : > { %1515 = vst.msk [vmem:[%s2127_s26 + $0xa8] sm:$0xff] %vm529_vm0, %v686_v8 }
 0x17d   : > { %v767_v9 = vpop.permute.xlu1 %766  ;;  %v611_v10 = vpop.permute.xlu2 %610 }
 0x17e   : > { %1531 = vst.msk [vmem:[%s2135_s27 + $0xa8] sm:$0xff] %vm529_vm0, %v767_v9  ;;  %v607_v11 = vpop.permute.xlu0 %606 }
 0x17f   : > { %1502 = vst.msk [vmem:[%s2122_s3 + $0xc0] sm:$0xff] %vm529_vm0, %v611_v10 }
 0x180   : > { %1500 = vst.msk [vmem:[%s2122_s3 + $0xb0] sm:$0xff] %vm529_vm0, %v607_v11 }
 0x185   : > { %v688_v12 = vpop.permute.xlu1 %687  ;;  %v781_v13 = vpop.permute.xlu2 %780 }
 0x186   : > { %1516 = vst.msk [vmem:[%s2127_s26 + $0xb0] sm:$0xff] %vm529_vm0, %v688_v12  ;;  %v704_v14 = vpop.permute.xlu0 %703  ;;  %v979_v56 = vld [vmem:[%s2122_s3 + $0xc0] sm:$0xff] (%p1938_p0) }
 0x187   : > { %1538 = vst.msk [vmem:[%s2135_s27 + $0xe0] sm:$0xff] %vm529_vm0, %v781_v13  ;;  %v975_v54 = vld [vmem:[%s2122_s3 + $0xb0] sm:$0xff] (%p1938_p0) }
 0x188   : > { %1524 = vst.msk [vmem:[%s2127_s26 + $0xf0] sm:$0xff] %vm529_vm0, %v704_v14 }
 0x189   : > { %976 = vst [vmem:[%s2377_s25 + $0x130] sm:$0xff] (%p1938_p0), %v975_v54 }
 0x18a   : > { %980 = vst [vmem:[%s2377_s25 + $0x140] sm:$0xff] (%p1938_p0), %v979_v56 }
 0x18d   : > { %v609_v15 = vpop.permute.xlu1 %608  ;;  %v775_v16 = vpop.permute.xlu2 %774 }
 0x18e   : > { %1501 = vst.msk [vmem:[%s2122_s3 + $0xb8] sm:$0xff] %vm529_vm0, %v609_v15  ;;  %v771_v17 = vpop.permute.xlu0 %770 }
 0x18f   : > { %1535 = vst.msk [vmem:[%s2135_s27 + $0xc8] sm:$0xff] %vm529_vm0, %v775_v16 }
 0x190   : > { %1533 = vst.msk [vmem:[%s2135_s27 + $0xb8] sm:$0xff] %vm529_vm0, %v771_v17 }
 0x195   : > { %v706_v18 = vpop.permute.xlu1 %705  ;;  %v696_v19 = vpop.permute.xlu2 %695  ;;  %v977_v55 = vld [vmem:[%s2122_s3 + $0xb8] sm:$0xff] (%p1938_p0) }
 0x196   : > { %1525 = vst.msk [vmem:[%s2127_s26 + $0xf8] sm:$0xff] %vm529_vm0, %v706_v18  ;;  %v692_v20 = vpop.permute.xlu0 %691 }
 0x197   : > { %1520 = vst.msk [vmem:[%s2127_s26 + $0xd0] sm:$0xff] %vm529_vm0, %v696_v19 }
 0x198   : > { %1518 = vst.msk [vmem:[%s2127_s26 + $0xc0] sm:$0xff] %vm529_vm0, %v692_v20 }
 0x199   : > { %978 = vst [vmem:[%s2377_s25 + $0x138] sm:$0xff] (%p1938_p0), %v977_v55 }
 0x19d   : > { %v773_v21 = vpop.permute.xlu1 %772  ;;  %v617_v22 = vpop.permute.xlu2 %616 }
 0x19e   : > { %1534 = vst.msk [vmem:[%s2135_s27 + $0xc0] sm:$0xff] %vm529_vm0, %v773_v21  ;;  %v613_v23 = vpop.permute.xlu0 %612 }
 0x19f   : > { %1503 = vst.msk [vmem:[%s2122_s3 + $0xc8] sm:$0xff] %vm529_vm0, %v613_v23 }
 0x1a0   : > { %1505 = vst.msk [vmem:[%s2122_s3 + $0xd8] sm:$0xff] %vm529_vm0, %v617_v22 }
 0x1a5   : > { %v694_v24 = vpop.permute.xlu1 %693  ;;  %v787_v25 = vpop.permute.xlu2 %786 }
 0x1a6   : > { %1519 = vst.msk [vmem:[%s2127_s26 + $0xc8] sm:$0xff] %vm529_vm0, %v694_v24  ;;  %v777_v26 = vpop.permute.xlu0 %776  ;;  %v981_v57 = vld [vmem:[%s2122_s3 + $0xc8] sm:$0xff] (%p1938_p0) }
 0x1a7   : > { %1536 = vst.msk [vmem:[%s2135_s27 + $0xd0] sm:$0xff] %vm529_vm0, %v777_v26  ;;  %v985_v59 = vld [vmem:[%s2122_s3 + $0xd8] sm:$0xff] (%p1938_p0) }
 0x1a8   : > { %1541 = vst.msk [vmem:[%s2135_s27 + $0xf8] sm:$0xff] %vm529_vm0, %v787_v25 }
 0x1a9   : > { %982 = vst [vmem:[%s2377_s25 + $0x148] sm:$0xff] (%p1938_p0), %v981_v57 }
 0x1aa   : > { %986 = vst [vmem:[%s2377_s25 + $0x158] sm:$0xff] (%p1938_p0), %v985_v59 }
 0x1ad   : > { %v615_v27 = vpop.permute.xlu1 %614 }
 0x1ae   : > { %1504 = vst.msk [vmem:[%s2122_s3 + $0xd0] sm:$0xff] %vm529_vm0, %v615_v27  ;;  %v698_v28 = vpop.permute.xlu0 %697 }
 0x1af   : > { %1521 = vst.msk [vmem:[%s2127_s26 + $0xd8] sm:$0xff] %vm529_vm0, %v698_v28 }
 0x1b5   : > { %v779_v29 = vpop.permute.xlu1 %778  ;;  %v983_v58 = vld [vmem:[%s2122_s3 + $0xd0] sm:$0xff] (%p1938_p0) }
 0x1b6   : > { %1537 = vst.msk [vmem:[%s2135_s27 + $0xd8] sm:$0xff] %vm529_vm0, %v779_v29  ;;  %v783_v30 = vpop.permute.xlu0 %782 }
 0x1b7   : > { %1539 = vst.msk [vmem:[%s2135_s27 + $0xe8] sm:$0xff] %vm529_vm0, %v783_v30 }
 0x1b8   : > { %984 = vst [vmem:[%s2377_s25 + $0x150] sm:$0xff] (%p1938_p0), %v983_v58 }
 0x1ba   : > { %835 = sbr.rel (!%p1938_p0) target bundleno = 447 (0x1bf), region = 40 }
 0x1bd   : > { %v785_v31 = vpop.permute.xlu1 %784 }
 0x1be   : > { %1540 = vst.msk [vmem:[%s2135_s27 + $0xf0] sm:$0xff] %vm529_vm0, %v785_v31 }
 0x1bf PF: > { %1000 = sbr.rel (!%p1938_p0) target bundleno = 487 (0x1e7), region = 78  ;;  %s1548_s12 = sshll.u32 (%p1938_p0), %s1805_s18, 4  ;;  %v1096_v0 = vld [vmem:[%s2127_s26] sm:$0xff] (%p1938_p0)  ;;  %v1098_v1 = vld [vmem:[%s2127_s26 + $0x8] sm:$0xff] (%p1938_p0)  ;;  %v1100_v2 = vld [vmem:[%s2127_s26 + $0x10] sm:$0xff] (%p1938_p0) }
 0x1c0   : > { %s1549_s28 = sshll.u32 (%p1938_p0), %s1809_s19, 6  ;;  %s2630_s9 = sld [smem:[#allocation14_spill]] (%p1938_p0)  ;;  %v1102_v3 = vld [vmem:[%s2127_s26 + $0x18] sm:$0xff] (%p1938_p0)  ;;  %v1104_v4 = vld [vmem:[%s2127_s26 + $0x20] sm:$0xff] (%p1938_p0)  ;;  %v1106_v5 = vld [vmem:[%s2127_s26 + $0x28] sm:$0xff] (%p1938_p0) }
 0x1c1   : > { %s1003_s29 = sadd.s32 (%p1938_p0), %s1549_s28, %s1548_s12  ;;  %v1108_v6 = vld [vmem:[%s2127_s26 + $0x30] sm:$0xff] (%p1938_p0)  ;;  %v1110_v7 = vld [vmem:[%s2127_s26 + $0x38] sm:$0xff] (%p1938_p0)  ;;  %v1112_v8 = vld [vmem:[%s2127_s26 + $0x40] sm:$0xff] (%p1938_p0) }
 0x1c2   : > { %s1550_s11 = sshll.u32 (%p1938_p0), %s1003_s29, 3  ;;  %v1114_v9 = vld [vmem:[%s2127_s26 + $0x48] sm:$0xff] (%p1938_p0)  ;;  %v1116_v10 = vld [vmem:[%s2127_s26 + $0x50] sm:$0xff] (%p1938_p0)  ;;  %v1118_v11 = vld [vmem:[%s2127_s26 + $0x58] sm:$0xff] (%p1938_p0) }
 0x1c3   : > { %v1120_v12 = vld [vmem:[%s2127_s26 + $0x60] sm:$0xff] (%p1938_p0)  ;;  %v1122_v13 = vld [vmem:[%s2127_s26 + $0x68] sm:$0xff] (%p1938_p0)  ;;  %v1124_v14 = vld [vmem:[%s2127_s26 + $0x70] sm:$0xff] (%p1938_p0) }
 0x1c4   : > { %v1126_v15 = vld [vmem:[%s2127_s26 + $0x78] sm:$0xff]  ;;  %v1128_v16 = vld [vmem:[%s2127_s26 + $0x80] sm:$0xff]  ;;  %v1130_v17 = vld [vmem:[%s2127_s26 + $0x88] sm:$0xff] }
 0x1c5   : > { %v1132_v18 = vld [vmem:[%s2127_s26 + $0x90] sm:$0xff]  ;;  %v1134_v19 = vld [vmem:[%s2127_s26 + $0x98] sm:$0xff]  ;;  %v1136_v20 = vld [vmem:[%s2127_s26 + $0xa0] sm:$0xff] }
 0x1c6   : > { %s2450_s2 = scalar_lea.vmem %s2630_s9, %s1550_s11  ;;  %v1138_v21 = vld [vmem:[%s2127_s26 + $0xa8] sm:$0xff]  ;;  %v1140_v22 = vld [vmem:[%s2127_s26 + $0xb0] sm:$0xff]  ;;  %v1142_v23 = vld [vmem:[%s2127_s26 + $0xb8] sm:$0xff] }
 0x1c7   : > { %1097 = vst [vmem:[%s2450_s2] sm:$0xff] %v1096_v0  ;;  %v1144_v24 = vld [vmem:[%s2127_s26 + $0xc0] sm:$0xff]  ;;  %v1146_v25 = vld [vmem:[%s2127_s26 + $0xc8] sm:$0xff]  ;;  %v1148_v26 = vld [vmem:[%s2127_s26 + $0xd0] sm:$0xff] }
 0x1c8   : > { %1099 = vst [vmem:[%s2450_s2 + $0x8] sm:$0xff] %v1098_v1  ;;  %v1150_v27 = vld [vmem:[%s2127_s26 + $0xd8] sm:$0xff]  ;;  %v1152_v28 = vld [vmem:[%s2127_s26 + $0xe0] sm:$0xff]  ;;  %v1154_v29 = vld [vmem:[%s2127_s26 + $0xe8] sm:$0xff] }
 0x1c9   : > { %1101 = vst [vmem:[%s2450_s2 + $0x10] sm:$0xff] %v1100_v2  ;;  %v1156_v30 = vld [vmem:[%s2127_s26 + $0xf0] sm:$0xff]  ;;  %v1158_v31 = vld [vmem:[%s2127_s26 + $0xf8] sm:$0xff] }
 0x1ca   : > { %1103 = vst [vmem:[%s2450_s2 + $0x18] sm:$0xff] %v1102_v3 }
 0x1cb   : > { %1105 = vst [vmem:[%s2450_s2 + $0x20] sm:$0xff] %v1104_v4 }
 0x1cc   : > { %1107 = vst [vmem:[%s2450_s2 + $0x28] sm:$0xff] %v1106_v5 }
 0x1cd   : > { %1109 = vst [vmem:[%s2450_s2 + $0x30] sm:$0xff] %v1108_v6 }
 0x1ce   : > { %1111 = vst [vmem:[%s2450_s2 + $0x38] sm:$0xff] %v1110_v7 }
 0x1cf   : > { %1113 = vst [vmem:[%s2450_s2 + $0x40] sm:$0xff] %v1112_v8 }
 0x1d0   : > { %1115 = vst [vmem:[%s2450_s2 + $0x48] sm:$0xff] %v1114_v9 }
 0x1d1   : > { %1117 = vst [vmem:[%s2450_s2 + $0x50] sm:$0xff] %v1116_v10 }
 0x1d2   : > { %1119 = vst [vmem:[%s2450_s2 + $0x58] sm:$0xff] %v1118_v11 }
 0x1d3   : > { %1121 = vst [vmem:[%s2450_s2 + $0x60] sm:$0xff] %v1120_v12 }
 0x1d4   : > { %1123 = vst [vmem:[%s2450_s2 + $0x68] sm:$0xff] %v1122_v13 }
 0x1d5   : > { %1125 = vst [vmem:[%s2450_s2 + $0x70] sm:$0xff] %v1124_v14 }
 0x1d6   : > { %1127 = vst [vmem:[%s2450_s2 + $0x78] sm:$0xff] %v1126_v15 }
 0x1d7   : > { %1129 = vst [vmem:[%s2450_s2 + $0x100] sm:$0xff] %v1128_v16 }
 0x1d8   : > { %1131 = vst [vmem:[%s2450_s2 + $0x108] sm:$0xff] %v1130_v17 }
 0x1d9   : > { %1133 = vst [vmem:[%s2450_s2 + $0x110] sm:$0xff] %v1132_v18 }
 0x1da   : > { %1135 = vst [vmem:[%s2450_s2 + $0x118] sm:$0xff] %v1134_v19 }
 0x1db   : > { %1137 = vst [vmem:[%s2450_s2 + $0x120] sm:$0xff] %v1136_v20 }
 0x1dc   : > { %1139 = vst [vmem:[%s2450_s2 + $0x128] sm:$0xff] %v1138_v21 }
 0x1dd   : > { %1141 = vst [vmem:[%s2450_s2 + $0x130] sm:$0xff] %v1140_v22 }
 0x1de   : > { %1143 = vst [vmem:[%s2450_s2 + $0x138] sm:$0xff] %v1142_v23 }
 0x1df   : > { %1145 = vst [vmem:[%s2450_s2 + $0x140] sm:$0xff] %v1144_v24 }
 0x1e0   : > { %1147 = vst [vmem:[%s2450_s2 + $0x148] sm:$0xff] %v1146_v25 }
 0x1e1   : > { %1149 = vst [vmem:[%s2450_s2 + $0x150] sm:$0xff] %v1148_v26 }
 0x1e2   : > { %1151 = vst [vmem:[%s2450_s2 + $0x158] sm:$0xff] %v1150_v27 }
 0x1e3   : > { %1153 = vst [vmem:[%s2450_s2 + $0x160] sm:$0xff] %v1152_v28 }
 0x1e4   : > { %1155 = vst [vmem:[%s2450_s2 + $0x168] sm:$0xff] %v1154_v29 }
 0x1e5   : > { %1157 = vst [vmem:[%s2450_s2 + $0x170] sm:$0xff] %v1156_v30 }
 0x1e6   : > { %1159 = vst [vmem:[%s2450_s2 + $0x178] sm:$0xff] %v1158_v31 }
 0x1e7 PF: > { %1165 = sbr.rel (!%p1938_p0) target bundleno = 527 (0x20f), region = 116  ;;  %s1551_s3 = sshll.u32 (%p1938_p0), %s1805_s18, 4  ;;  %v1261_v32 = vld [vmem:[%s2135_s27] sm:$0xff] (%p1938_p0)  ;;  %v1263_v33 = vld [vmem:[%s2135_s27 + $0x8] sm:$0xff] (%p1938_p0)  ;;  %v1265_v34 = vld [vmem:[%s2135_s27 + $0x10] sm:$0xff] (%p1938_p0) }
 0x1e8   : > { %s1552_s24 = sshll.u32 (%p1938_p0), %s1809_s19, 6  ;;  %s2631_s23 = sld [smem:[#allocation15_spill]] (%p1938_p0)  ;;  %v1267_v35 = vld [vmem:[%s2135_s27 + $0x18] sm:$0xff] (%p1938_p0)  ;;  %v1269_v36 = vld [vmem:[%s2135_s27 + $0x20] sm:$0xff] (%p1938_p0)  ;;  %v1271_v37 = vld [vmem:[%s2135_s27 + $0x28] sm:$0xff] (%p1938_p0) }
 0x1e9   : > { %s1168_s26 = sadd.s32 (%p1938_p0), %s1552_s24, %s1551_s3  ;;  %v1273_v38 = vld [vmem:[%s2135_s27 + $0x30] sm:$0xff] (%p1938_p0)  ;;  %v1275_v39 = vld [vmem:[%s2135_s27 + $0x38] sm:$0xff] (%p1938_p0)  ;;  %v1277_v40 = vld [vmem:[%s2135_s27 + $0x40] sm:$0xff] (%p1938_p0) }
 0x1ea   : > { %s1553_s13 = sshll.u32 (%p1938_p0), %s1168_s26, 3  ;;  %v1279_v41 = vld [vmem:[%s2135_s27 + $0x48] sm:$0xff] (%p1938_p0)  ;;  %v1281_v42 = vld [vmem:[%s2135_s27 + $0x50] sm:$0xff] (%p1938_p0)  ;;  %v1283_v43 = vld [vmem:[%s2135_s27 + $0x58] sm:$0xff] (%p1938_p0) }
 0x1eb   : > { %v1285_v44 = vld [vmem:[%s2135_s27 + $0x60] sm:$0xff] (%p1938_p0)  ;;  %v1287_v45 = vld [vmem:[%s2135_s27 + $0x68] sm:$0xff] (%p1938_p0)  ;;  %v1289_v46 = vld [vmem:[%s2135_s27 + $0x70] sm:$0xff] (%p1938_p0) }
 0x1ec   : > { %v1291_v47 = vld [vmem:[%s2135_s27 + $0x78] sm:$0xff]  ;;  %v1293_v48 = vld [vmem:[%s2135_s27 + $0x80] sm:$0xff]  ;;  %v1295_v49 = vld [vmem:[%s2135_s27 + $0x88] sm:$0xff] }
 0x1ed   : > { %v1297_v50 = vld [vmem:[%s2135_s27 + $0x90] sm:$0xff]  ;;  %v1299_v51 = vld [vmem:[%s2135_s27 + $0x98] sm:$0xff]  ;;  %v1301_v52 = vld [vmem:[%s2135_s27 + $0xa0] sm:$0xff] }
 0x1ee   : > { %s2523_s30 = scalar_lea.vmem %s2631_s23, %s1553_s13  ;;  %v1303_v53 = vld [vmem:[%s2135_s27 + $0xa8] sm:$0xff]  ;;  %v1305_v54 = vld [vmem:[%s2135_s27 + $0xb0] sm:$0xff]  ;;  %v1307_v55 = vld [vmem:[%s2135_s27 + $0xb8] sm:$0xff] }
 0x1ef   : > { %1262 = vst [vmem:[%s2523_s30] sm:$0xff] %v1261_v32  ;;  %v1309_v56 = vld [vmem:[%s2135_s27 + $0xc0] sm:$0xff]  ;;  %v1311_v57 = vld [vmem:[%s2135_s27 + $0xc8] sm:$0xff]  ;;  %v1313_v58 = vld [vmem:[%s2135_s27 + $0xd0] sm:$0xff] }
 0x1f0   : > { %1264 = vst [vmem:[%s2523_s30 + $0x8] sm:$0xff] %v1263_v33  ;;  %v1315_v59 = vld [vmem:[%s2135_s27 + $0xd8] sm:$0xff]  ;;  %v1317_v60 = vld [vmem:[%s2135_s27 + $0xe0] sm:$0xff]  ;;  %v1319_v61 = vld [vmem:[%s2135_s27 + $0xe8] sm:$0xff] }
 0x1f1   : > { %1266 = vst [vmem:[%s2523_s30 + $0x10] sm:$0xff] %v1265_v34  ;;  %v1321_v62 = vld [vmem:[%s2135_s27 + $0xf0] sm:$0xff]  ;;  %v1323_v63 = vld [vmem:[%s2135_s27 + $0xf8] sm:$0xff] }
 0x1f2   : > { %1268 = vst [vmem:[%s2523_s30 + $0x18] sm:$0xff] %v1267_v35 }
 0x1f3   : > { %1270 = vst [vmem:[%s2523_s30 + $0x20] sm:$0xff] %v1269_v36 }
 0x1f4   : > { %1272 = vst [vmem:[%s2523_s30 + $0x28] sm:$0xff] %v1271_v37 }
 0x1f5   : > { %1274 = vst [vmem:[%s2523_s30 + $0x30] sm:$0xff] %v1273_v38 }
 0x1f6   : > { %1276 = vst [vmem:[%s2523_s30 + $0x38] sm:$0xff] %v1275_v39 }
 0x1f7   : > { %1278 = vst [vmem:[%s2523_s30 + $0x40] sm:$0xff] %v1277_v40 }
 0x1f8   : > { %1280 = vst [vmem:[%s2523_s30 + $0x48] sm:$0xff] %v1279_v41 }
 0x1f9   : > { %1282 = vst [vmem:[%s2523_s30 + $0x50] sm:$0xff] %v1281_v42 }
 0x1fa   : > { %1284 = vst [vmem:[%s2523_s30 + $0x58] sm:$0xff] %v1283_v43 }
 0x1fb   : > { %1286 = vst [vmem:[%s2523_s30 + $0x60] sm:$0xff] %v1285_v44 }
 0x1fc   : > { %1288 = vst [vmem:[%s2523_s30 + $0x68] sm:$0xff] %v1287_v45 }
 0x1fd   : > { %1290 = vst [vmem:[%s2523_s30 + $0x70] sm:$0xff] %v1289_v46 }
 0x1fe   : > { %1292 = vst [vmem:[%s2523_s30 + $0x78] sm:$0xff] %v1291_v47 }
 0x1ff   : > { %1294 = vst [vmem:[%s2523_s30 + $0x100] sm:$0xff] %v1293_v48 }
 0x200   : > { %1296 = vst [vmem:[%s2523_s30 + $0x108] sm:$0xff] %v1295_v49 }
 0x201   : > { %1298 = vst [vmem:[%s2523_s30 + $0x110] sm:$0xff] %v1297_v50 }
 0x202   : > { %1300 = vst [vmem:[%s2523_s30 + $0x118] sm:$0xff] %v1299_v51 }
 0x203   : > { %1302 = vst [vmem:[%s2523_s30 + $0x120] sm:$0xff] %v1301_v52 }
 0x204   : > { %1304 = vst [vmem:[%s2523_s30 + $0x128] sm:$0xff] %v1303_v53 }
 0x205   : > { %1306 = vst [vmem:[%s2523_s30 + $0x130] sm:$0xff] %v1305_v54 }
 0x206   : > { %1308 = vst [vmem:[%s2523_s30 + $0x138] sm:$0xff] %v1307_v55 }
 0x207   : > { %1310 = vst [vmem:[%s2523_s30 + $0x140] sm:$0xff] %v1309_v56 }
 0x208   : > { %1312 = vst [vmem:[%s2523_s30 + $0x148] sm:$0xff] %v1311_v57 }
 0x209   : > { %1314 = vst [vmem:[%s2523_s30 + $0x150] sm:$0xff] %v1313_v58 }
 0x20a   : > { %1316 = vst [vmem:[%s2523_s30 + $0x158] sm:$0xff] %v1315_v59 }
 0x20b   : > { %1318 = vst [vmem:[%s2523_s30 + $0x160] sm:$0xff] %v1317_v60 }
 0x20c   : > { %1320 = vst [vmem:[%s2523_s30 + $0x168] sm:$0xff] %v1319_v61 }
 0x20d   : > { %1322 = vst [vmem:[%s2523_s30 + $0x170] sm:$0xff] %v1321_v62 }
 0x20e   : > { %1324 = vst [vmem:[%s2523_s30 + $0x178] sm:$0xff] %v1323_v63 }
 0x20f PF: > { %s19_s22 = sadd.s32 1, %s1821_s22   ;;  %s2632_s5 = sld [smem:[#allocation11_spill]] }
 0x210   : > { %p16_p1 = scmp.ge.s32.totalorder %s19_s22, 6   ;;  %s2633_s15 = smov %s1797_s16 }
 0x211   : > { %s2634_s16 = smov %s1801_s17  ;;  %s2635_s17 = smov %s1951_s8 }
 0x212   : > { %s2636_s18 = smov %s1813_s20  ;;  %s2637_s19 = smov %s1817_s21 }
 0x213   : > { %s2639_s21 = smov %s2645_s10  ;;  %18 = sbr.rel (!%p16_p1) target bundleno = 11 (0xb), region = 213 }
 0x215   : > { %s2638_s20 = smov %s2632_s5 }
 0x218   :  { %1354 = vsyncpa [#allocation3], 1 }
 0x219   :  { %1356 = vsyncpa [#allocation3 + $0x1], 1 }
 0x21a   :  { %1357 = vsyncpa [#allocation5], 1 }

</bundles_post_ra>
